<compile_context>
chip_gen: v6e
topology: v6e:2x2x1
jax: 0.10.0
libtpu: 0.0.40
codegen_flags: <defaults>
</compile_context>

<pallas_src>
import jax
import jax.numpy as jnp
from jax.experimental import pallas as pl
from jax.experimental.pallas import tpu as pltpu

_LANE = 128


def _round_up(v, m):
    return ((v + m - 1) // m) * m


def mlp_kernel(x_ref, w1_ref, b1_ref, w2_ref, b2_ref, w3_ref, b3_ref, o_ref):
    # x_ref : [tb, n_input]   native batch-major tile (bf16 or f32)
    # w*_ref: PyTorch-native [out_features, in_features], f32, VMEM-resident
    # b1/b2 : [n_hidden, 1]   column vectors (broadcast across lanes)
    # b3    : f32[1] scalar in SMEM
    # o_ref : [1, 1, tb]      one dense lane-row of outputs for this tile
    x = x_ref[...].astype(jnp.float32)  # exact upcast ({0,1} bf16 -> f32)

    # h1 = W1 @ x^T : contract the feature dims of W1 [h, f] and x [b, f].
    # The batch lands on lanes, so every later op (bias, relu, dots, store)
    # is lane-dense; the transpose is done in-kernel on the XLU.
    h = jax.lax.dot_general(
        w1_ref[...], x,
        dimension_numbers=(((1,), (1,)), ((), ())),
        preferred_element_type=jnp.float32,
    )                                                   # [n_hidden, tb]
    h = jnp.maximum(h + b1_ref[...], 0.0)
    h = jnp.dot(w2_ref[...], h, preferred_element_type=jnp.float32)
    h = jnp.maximum(h + b2_ref[...], 0.0)
    out = jnp.dot(w3_ref[...], h, preferred_element_type=jnp.float32)  # [1, tb]
    o_ref[...] = (out + b3_ref[0])[None].astype(o_ref.dtype)           # [1,1,tb]


def simple_mlp_forward(x, w1, b1, w2, b2, w3, b3, *,
                       block_batch=16384, min_steps=8, x_dtype=jnp.bfloat16):
    """MLP forward pass in one Pallas kernel, tiled over the batch.

    x : [batch, n_input]          (PyTorch layout, ingested as-is)
    w1: [n_hidden, n_input]  b1: [n_hidden]
    w2: [n_hidden, n_hidden] b2: [n_hidden]
    w3: [1, n_hidden]        b3: [1]
    returns [batch, 1] float32
    """
    batch, n_input = x.shape
    n_hidden = w1.shape[0]

    # ---- batch tiling -------------------------------------------------------
    cap = max(_LANE, _round_up(int(block_batch), _LANE))   # lane-aligned cap
    padded0 = _round_up(batch, _LANE)
    tb = min(cap, padded0)
    # Keep >= min_steps grid steps when the batch is large enough: gives the
    # pipeline something to overlap and shards usefully over v7x's 2 cores.
    if padded0 // tb < min_steps:
        tb = min(tb, max(_LANE, _round_up(pl.cdiv(padded0, min_steps), _LANE)))
    padded = _round_up(batch, tb)
    grid_b = padded // tb

    # ---- inputs -------------------------------------------------------------
    # Single-pass, native-layout ingestion of x. bf16 is exact for {0,1}
    # concept inputs; pass x already as bf16 to avoid even the cast pass.
    if x.dtype != x_dtype:
        x = x.astype(x_dtype)
    if padded != batch:
        x = jnp.pad(x, ((0, padded - batch), (0, 0)))

    w1 = w1.astype(jnp.float32)
    w2 = w2.astype(jnp.float32)
    w3 = w3.astype(jnp.float32)
    b1c = b1.reshape(n_hidden, 1).astype(jnp.float32)
    b2c = b2.reshape(n_hidden, 1).astype(jnp.float32)
    b3s = b3.reshape(1).astype(jnp.float32)               # SMEM scalar

    const = lambda i: (0, 0)                              # params resident

    # ---- VMEM budget (explicit, per review) ---------------------------------
    # The (tb, n_input) x block is padded to 128 lanes in VMEM; budget for the
    # double-buffered x stream, its f32 upcast, the [32, tb] intermediates and
    # the (sublane-padded) output row, with 1.5x slack.
    xbytes = jnp.dtype(x.dtype).itemsize
    vmem_est = tb * (2 * _LANE * xbytes      # double-buffered x blocks
                     + _LANE * 4             # f32 upcast of the x tile
                     + 4 * n_hidden * 4      # hidden activations (+slack)
                     + 3 * 8 * 4)            # out row + double-buffered out blocks
    vmem_limit = int(min(max(vmem_est * 3 // 2, 32 * 1024 * 1024),
                         48 * 1024 * 1024))  # stays inside v7x's 64 MiB/TC

    flops = 2 * padded * (n_input * n_hidden + n_hidden * n_hidden + n_hidden)
    param_bytes = 4 * (w1.size + b1.size + w2.size + b2.size + w3.size + b3.size)
    cost = pl.CostEstimate(
        flops=flops,
        transcendentals=0,
        bytes_accessed=padded * n_input * xbytes + 4 * padded + param_bytes,
    )

    out = pl.pallas_call(
        mlp_kernel,
        out_shape=jax.ShapeDtypeStruct((grid_b, 1, tb), jnp.float32),
        grid=(grid_b,),
        in_specs=[
            pl.BlockSpec((tb, n_input), lambda i: (i, 0)),        # x stream
            pl.BlockSpec((n_hidden, n_input), const),             # W1
            pl.BlockSpec((n_hidden, 1), const),                   # b1
            pl.BlockSpec((n_hidden, n_hidden), const),            # W2
            pl.BlockSpec((n_hidden, 1), const),                   # b2
            pl.BlockSpec((1, n_hidden), const),                   # W3
            pl.BlockSpec(memory_space=pltpu.MemorySpace.SMEM),    # b3 scalar
        ],
        out_specs=pl.BlockSpec((1, 1, tb), lambda i: (i, 0, 0)),
        compiler_params=pltpu.CompilerParams(
            dimension_semantics=("parallel",),
            vmem_limit_bytes=vmem_limit,
        ),
        cost_estimate=cost,
    )(x, w1, b1c, w2, b2c, w3, b3s)

    # (grid_b, 1, tb) rows are consecutive batch tiles: flatten, drop padding,
    # return in PyTorch layout [batch, 1].
    return out.reshape(-1)[:batch].reshape(batch, 1)


def init_params(key, n_input=8, n_hidden=32):
    """nn.Linear-style init, PyTorch-native shapes: W [out, in], b [out]."""
    ks = jax.random.split(key, 6)

    def linear_init(kw, kb, fan_in, fan_out):
        bound = 1.0 / jnp.sqrt(jnp.float32(fan_in))
        w = jax.random.uniform(kw, (fan_out, fan_in), jnp.float32, -bound, bound)
        b = jax.random.uniform(kb, (fan_out,), jnp.float32, -bound, bound)
        return w, b

    w1, b1 = linear_init(ks[0], ks[1], n_input, n_hidden)
    w2, b2 = linear_init(ks[2], ks[3], n_hidden, n_hidden)
    w3, b3 = linear_init(ks[4], ks[5], n_hidden, 1)
    return w1, b1, w2, b2, w3, b3


if __name__ == "__main__":
    # batch=10000 is small but deliberately not lane/tile aligned, so it
    # exercises padding and a multi-step (8-tile) "parallel" grid.
    n_input, n_hidden, batch = 8, 32, 10000

    key = jax.random.PRNGKey(0)
    k_params, k_x = jax.random.split(key)

    params = init_params(k_params, n_input, n_hidden)
    # Boolean-concept inputs in {0, 1}; bf16 is exact for these values, so the
    # kernel ingests x at half the HBM bytes with no numerical change.
    x = jax.random.bernoulli(k_x, 0.5, (batch, n_input)).astype(jnp.bfloat16)

    out = jax.block_until_ready(simple_mlp_forward(x, *params))

    # Pure-JAX f32 reference of the same forward (PyTorch convention x @ W.T + b).
    w1, b1, w2, b2, w3, b3 = params
    xf = x.astype(jnp.float32)
    ref = jnp.maximum(xf @ w1.T + b1[None, :], 0.0)
    ref = jnp.maximum(ref @ w2.T + b2[None, :], 0.0)
    ref = ref @ w3.T + b3[None, :]

    assert out.shape == (batch, 1)
    assert jnp.allclose(out, ref, atol=1e-5, rtol=1e-5)

    print("KERNEL_OK")
</pallas_src>

<mosaic_0001>
module attributes {stable_mosaic.version = 11 : i64} {
  func.func @mlp_kernel(%arg0: i32, %arg1: memref<1280x8xbf16, #tpu.memory_space<vmem>>, %arg2: memref<32x8xf32, #tpu.memory_space<vmem>>, %arg3: memref<32x1xf32, #tpu.memory_space<vmem>>, %arg4: memref<32x32xf32, #tpu.memory_space<vmem>>, %arg5: memref<32x1xf32, #tpu.memory_space<vmem>>, %arg6: memref<1x32xf32, #tpu.memory_space<vmem>>, %arg7: memref<1xf32, #tpu.memory_space<smem>>, %arg8: memref<1x1x1280xf32, #tpu.memory_space<vmem>>) attributes {dimension_semantics = [#tpu.dimension_semantics<parallel>], iteration_bounds = array<i64: 8>, scalar_prefetch = 0 : i64, scratch_operands = 0 : i64, tpu.core_type = #tpu.core_type<tc>, window_params = [{transform_indices = @transform_0, window_bounds = array<i64: 1280, 8>}, {pipeline_mode = #tpu.pipeline_mode<synchronous>, transform_indices = @transform_1, window_bounds = array<i64: 32, 8>}, {pipeline_mode = #tpu.pipeline_mode<synchronous>, transform_indices = @transform_2, window_bounds = array<i64: 32, 1>}, {pipeline_mode = #tpu.pipeline_mode<synchronous>, transform_indices = @transform_3, window_bounds = array<i64: 32, 32>}, {pipeline_mode = #tpu.pipeline_mode<synchronous>, transform_indices = @transform_4, window_bounds = array<i64: 32, 1>}, {pipeline_mode = #tpu.pipeline_mode<synchronous>, transform_indices = @transform_5, window_bounds = array<i64: 1, 32>}, {transform_indices = @transform_6, window_bounds = array<i64: 1>}, {transform_indices = @transform_7, window_bounds = array<i64: 1, 1, 1280>}]} {
    %c0 = arith.constant 0 : index
    %c0_0 = arith.constant 0 : index
    %0 = vector.load %arg1[%c0, %c0_0] : memref<1280x8xbf16, #tpu.memory_space<vmem>>, vector<1280x8xbf16>
    %1 = arith.extf %0 : vector<1280x8xbf16> to vector<1280x8xf32>
    %c0_1 = arith.constant 0 : index
    %c0_2 = arith.constant 0 : index
    %2 = vector.load %arg2[%c0_1, %c0_2] : memref<32x8xf32, #tpu.memory_space<vmem>>, vector<32x8xf32>
    %cst = arith.constant dense<0.000000e+00> : vector<32x1280xf32>
    %3 = tpu.matmul %2, %1, %cst {dimension_numbers = #tpu.dot_dimension_numbers<[1], [1], [0], [0], [0, 0, 1, 0], [], []>} : vector<32x8xf32>, vector<1280x8xf32>, vector<32x1280xf32> -> vector<32x1280xf32>
    %c0_3 = arith.constant 0 : index
    %c0_4 = arith.constant 0 : index
    %4 = vector.load %arg3[%c0_3, %c0_4] : memref<32x1xf32, #tpu.memory_space<vmem>>, vector<32x1xf32>
    %5 = vector.broadcast %4 : vector<32x1xf32> to vector<32x1280xf32>
    %6 = arith.addf %3, %5 : vector<32x1280xf32>
    %cst_5 = arith.constant 0.000000e+00 : f32
    %7 = vector.broadcast %cst_5 : f32 to vector<32x1280xf32>
    %8 = arith.maximumf %6, %7 : vector<32x1280xf32>
    %c0_6 = arith.constant 0 : index
    %c0_7 = arith.constant 0 : index
    %9 = vector.load %arg4[%c0_6, %c0_7] : memref<32x32xf32, #tpu.memory_space<vmem>>, vector<32x32xf32>
    %cst_8 = arith.constant dense<0.000000e+00> : vector<32x1280xf32>
    %10 = tpu.matmul %9, %8, %cst_8 {dimension_numbers = #tpu.dot_dimension_numbers<[1], [0], [0], [1], [0, 0, 1, 1], [], []>} : vector<32x32xf32>, vector<32x1280xf32>, vector<32x1280xf32> -> vector<32x1280xf32>
    %c0_9 = arith.constant 0 : index
    %c0_10 = arith.constant 0 : index
    %11 = vector.load %arg5[%c0_9, %c0_10] : memref<32x1xf32, #tpu.memory_space<vmem>>, vector<32x1xf32>
    %12 = vector.broadcast %11 : vector<32x1xf32> to vector<32x1280xf32>
    %13 = arith.addf %10, %12 : vector<32x1280xf32>
    %cst_11 = arith.constant 0.000000e+00 : f32
    %14 = vector.broadcast %cst_11 : f32 to vector<32x1280xf32>
    %15 = arith.maximumf %13, %14 : vector<32x1280xf32>
    %c0_12 = arith.constant 0 : index
    %c0_13 = arith.constant 0 : index
    %16 = vector.load %arg6[%c0_12, %c0_13] : memref<1x32xf32, #tpu.memory_space<vmem>>, vector<1x32xf32>
    %cst_14 = arith.constant dense<0.000000e+00> : vector<1x1280xf32>
    %17 = tpu.matmul %16, %15, %cst_14 {dimension_numbers = #tpu.dot_dimension_numbers<[1], [0], [0], [1], [0, 0, 1, 1], [], []>} : vector<1x32xf32>, vector<32x1280xf32>, vector<1x1280xf32> -> vector<1x1280xf32>
    %c0_15 = arith.constant 0 : index
    %18 = memref.load %arg7[%c0_15] : memref<1xf32, #tpu.memory_space<smem>>
    %19 = vector.broadcast %18 : f32 to vector<1x1280xf32>
    %20 = arith.addf %17, %19 : vector<1x1280xf32>
    %21 = vector.shape_cast %20 : vector<1x1280xf32> to vector<1x1x1280xf32>
    %c0_16 = arith.constant 0 : index
    %c0_17 = arith.constant 0 : index
    %c0_18 = arith.constant 0 : index
    %22 = vector.load %arg8[%c0_16, %c0_17, %c0_18] : memref<1x1x1280xf32, #tpu.memory_space<vmem>>, vector<1x1x1280xf32>
    tpu.vector_store %arg8[%c0_16, %c0_17, %c0_18], %21 {strides = array<i32>} : memref<1x1x1280xf32, #tpu.memory_space<vmem>>, vector<1x1x1280xf32>,
    return
  }
  func.func @transform_0(%arg0: i32) -> (i32, i32) {
    %c0_i32 = arith.constant 0 : i32
    %c0_i32_0 = arith.constant 0 : i32
    return %arg0, %c0_i32 : i32, i32
  }
  func.func @transform_1(%arg0: i32) -> (i32, i32) {
    %c0_i32 = arith.constant 0 : i32
    %c0_i32_0 = arith.constant 0 : i32
    %c0_i32_1 = arith.constant 0 : i32
    return %c0_i32, %c0_i32_0 : i32, i32
  }
  func.func @transform_2(%arg0: i32) -> (i32, i32) {
    %c0_i32 = arith.constant 0 : i32
    %c0_i32_0 = arith.constant 0 : i32
    %c0_i32_1 = arith.constant 0 : i32
    return %c0_i32, %c0_i32_0 : i32, i32
  }
  func.func @transform_3(%arg0: i32) -> (i32, i32) {
    %c0_i32 = arith.constant 0 : i32
    %c0_i32_0 = arith.constant 0 : i32
    %c0_i32_1 = arith.constant 0 : i32
    return %c0_i32, %c0_i32_0 : i32, i32
  }
  func.func @transform_4(%arg0: i32) -> (i32, i32) {
    %c0_i32 = arith.constant 0 : i32
    %c0_i32_0 = arith.constant 0 : i32
    %c0_i32_1 = arith.constant 0 : i32
    return %c0_i32, %c0_i32_0 : i32, i32
  }
  func.func @transform_5(%arg0: i32) -> (i32, i32) {
    %c0_i32 = arith.constant 0 : i32
    %c0_i32_0 = arith.constant 0 : i32
    %c0_i32_1 = arith.constant 0 : i32
    return %c0_i32, %c0_i32_0 : i32, i32
  }
  func.func @transform_6(%arg0: i32) -> i32 {
    %c0_i32 = arith.constant 0 : i32
    %c0_i32_0 = arith.constant 0 : i32
    return %c0_i32 : i32
  }
  func.func @transform_7(%arg0: i32) -> (i32, i32, i32) {
    %c0_i32 = arith.constant 0 : i32
    %c0_i32_0 = arith.constant 0 : i32
    %c0_i32_1 = arith.constant 0 : i32
    return %arg0, %c0_i32, %c0_i32_0 : i32, i32, i32
  }
}

</mosaic_0001>

<bundles_post_ra>
// kernel: tpu_custom_call.1
= control target key start
LH: loop header
LB: loop body
LE: loop exit
PB: predicated region body
PF: predicated region fallthrough
CT: control target
= control target key end

     0   :  { %s4264_s0 = inlined_call_operand.vmem [shape: bf16[10240,8], index: 0, kind: input, shape index: {}]   ;;  %s4265_s1 = inlined_call_operand.vmem [shape: f32[32,8], index: 1, kind: input, shape index: {}]   ;;  %s4266_s2 = inlined_call_operand.vmem [shape: f32[32,1], index: 2, kind: input, shape index: {}]   ;;  %s4267_s3 = inlined_call_operand.vmem [shape: f32[32,32], index: 3, kind: input, shape index: {}]   ;;  %s4268_s4 = inlined_call_operand.vmem [shape: f32[32,1], index: 4, kind: input, shape index: {}]   ;;  %s4269_s5 = inlined_call_operand.vmem [shape: f32[1,32], index: 5, kind: input, shape index: {}]   ;;  %s4270_s6 = inlined_call_operand.<no memory space> [shape: f32[1], index: 6, kind: input, shape index: {}]   ;;  %s4271_s7 = inlined_call_operand.hbm [shape: f32[8,1,1280], index: 7, kind: output, shape index: {}]  }
   0x1   :  { %12 = sst [smem:[#allocation2]] %s4270_s6 }
   0x2   :  { %13 = vsyncpa [#allocation4], 0 }
   0x3   :  { %15 = vsyncpa [#allocation4 + $0x1], 0  ;;  %s3616_s26 = smov 0   ;;  %s3618_s27 = smov 0  }
   0x4   :  { %s3620_s28 = smov 0   ;;  %s3622_s29 = smov 0  }
   0x5 LB: > { %s2648_s6 = sadd.s32 4294967295, %s3567_s29   ;;  %s2649_s30 = sadd.s32 4294967294, %s3567_s29   ;;  %s3567_s29 = sphi %s3622_s29, %s4277_s29   ;;  %s3563_s28 = sphi %s3620_s28, %s4276_s28   ;;  %s3559_s27 = sphi %s3618_s27, %s4275_s27   ;;  %s3555_s26 = sphi %s3616_s26, %s4274_s26  }
   0x6   : > { %s3639_s8 = sadd.s32 1, %s3567_s29   ;;  %s180_s9 = sadd.s32 1, %s3563_s28 }
   0x7   : > { %s177_s10 = ssub.s32 %s3567_s29, %s3639_s8  ;;  %p190_p0 = scmp.ne.s32.totalorder %s3563_s28, %s3559_s27 }
   0x8   : > { %p178_p1 = scmp.eq.s32.totalorder %s177_s10, 0  ;;  %p191_p2 = scmp.eq.s32.totalorder %s2648_s6, 7 }
   0x9   : > { %p196_p3 = scmp.ne.s32.totalorder %s3559_s27, %s3555_s26  ;;  %p197_p4 = scmp.eq.s32.totalorder %s2649_s30, 7 }
   0xa   : > { %s3649_s11 = scalar_select %p178_p1, %s3563_s28, %s180_s9  }
   0xb   : > { %p3651_p5 = por %p191_p2, %p190_p0  ;;  %p3655_p6 = por %p197_p4, %p196_p3 }
   0xc   : > { %p2652_p7 = scmp.ge.s32.totalorder %s3567_s29, 1  ;;  %p242_p8 = scmp.lt.s32.totalorder %s3567_s29, 9 }
   0xe   : > { %p243_p9 = pnand %p2652_p7, %p242_p8 }
   0xf   : > { %s3661_s14 = smul.u32 (!%p243_p9), 160, %s2648_s6  ;;  %s2133_s25 = sld [smem:[#allocation2]] (!%p243_p9) }
  0x10   : > { %246 = sbr.rel (%p243_p9) target bundleno = 874 (0x36a), region = 48  ;;  %s271_s6 = sand.u32 (!%p243_p9), 1, %s3559_s27  }
  0x11   : > { %p275_p10 = scmp.lt.s32.totalorder (!%p243_p9), %s3661_s14, 1279  ;;  %s3461_s30 = smul.u32 (!%p243_p9), 10, %s271_s6 }
  0x12   : > { %s2588_s16 = scalar_lea.hbm (!%p243_p9), %s4271_s7, %s3661_s14  ;;  %s3572_s19 = smov (!%p243_p9), [#allocation3]  }
  0x13   : > { %s273_s9 = scalar_lea.vmem (!%p243_p9), [#allocation3], %s3461_s30  ;;  %s3511_s20 = sshll.u32 (!%p243_p9), %s3572_s19, 4  ;;  %s3512_s20 = int_to_ptr.vmem [resolvable:$false] %s3511_s20 }
  0x14   : > { %s2590_s10 = sshll.u32 (!%p243_p9), %s273_s9, 4  ;;  %s3513_s22 = scalar_lea.vmem (!%p243_p9), %s3512_s20, 320  ;;  %s2591_s10 = int_to_ptr.vmem [resolvable:$true] %s2590_s10 }
  0x15   : > { %vm628_vm0 = vcmask 64512   ;;  %v3666_v0 = vld [vmem:[%s4265_s1] sm:$0xff]  ;;  %s276_s17 = scalar_select %p275_p10, %s3661_s14, 1279  ;;  %v605_v56 = vld [vmem:[%s4266_s2 + $0x8] sm:$0xff]  ;;  %v607_v59 = vld [vmem:[%s4266_s2 + $0x18] sm:$0xff]  ;;  %v3569_v62 = vmov 0  }
  0x16   : > { %3293 = vmatprep.mubr.msk.f32.mxu0 %vm628_vm0, %v3666_v0  ;;  %3333 = vmatprep.mubr.msk.f32.mxu1 %vm628_vm0, %v3666_v0  ;;  %vm1634_vm1 = vcmask 261120   ;;  %p3514_p0 = scmp.lt.s32.totalorder %s2591_s10, %s3512_s20 }
  0x17   : > { %s2653_s18 = sshll.u32 %s276_s17, 2  ;;  %3506 = vset.pattern.permute.xlu1 %v3569_v62  ;;  %3505 = vset.pattern.permute.xlu0 %v3569_v62  ;;  %s2576_s17 = scalar_lea.sflag [#allocation4], %s271_s6 }
  0x18   : > { %s3677_s21 = scalar_lea.vmem %s4264_s0, %s2653_s18  ;;  %615 = vperm.xlu1 %3506, %v605_v56   ;;  %625 = vperm.xlu0 %3505, %v607_v59   ;;  %s3507_s18 = scalar_lea.vmem %s2591_s10, 160 }
  0x19   : > { %v3196_v1 = vld [vmem:[%s3677_s21 + $0x78] sm:$0xff]   ;;  %v3195_v8 = vld [vmem:[%s3677_s21 + $0x70] sm:$0xff]   ;;  %v3194_v22 = vld [vmem:[%s3677_s21 + $0x68] sm:$0xff]   ;;  %p3508_p11 = scmp.ne.s32.totalorder %s2591_s10, %s3507_s18  ;;  %p3515_p1 = scmp.lt.s32.totalorder %s3513_s22, %s3507_s18 }
  0x1a   : > { %v3188_v2 = vld [vmem:[%s3677_s21 + $0x38] sm:$0xff]   ;;  %v2924_v3 = vunpack.c.l.bf16 %v3196_v1  ;;  %v2925_v4 = vunpack.c.h.bf16 %v3196_v1  ;;  %v3211_v12 = vld [vmem:[%s3677_s21 + $0xf0] sm:$0xff]   ;;  %v2921_v14 = vunpack.c.h.bf16 %v3195_v8  ;;  %v2920_v20 = vunpack.c.l.bf16 %v3195_v8  ;;  %v3210_v24 = vld [vmem:[%s3677_s21 + $0xe8] sm:$0xff]  }
  0x1b   : > { %v2893_v5 = vunpack.c.h.bf16 %v3188_v2  ;;  %v3212_v6 = vld [vmem:[%s3677_s21 + $0xf8] sm:$0xff]   ;;  %v2892_v13 = vunpack.c.l.bf16 %v3188_v2  ;;  %v3187_v15 = vld [vmem:[%s3677_s21 + $0x30] sm:$0xff]   ;;  %v2985_v17 = vunpack.c.h.bf16 %v3211_v12  ;;  %v2984_v23 = vunpack.c.l.bf16 %v3211_v12  ;;  %v3186_v27 = vld [vmem:[%s3677_s21 + $0x28] sm:$0xff]   ;;  %p3509_p12 = pnand %p3508_p11, %p3651_p5  ;;  %p3516_p2 = por %p3515_p1, %p3514_p0 }
  0x1c   : > { %v3204_v7 = vld [vmem:[%s3677_s21 + $0xb8] sm:$0xff]   ;;  %v2988_v9 = vunpack.c.l.bf16 %v3212_v6  ;;  %v2989_v10 = vunpack.c.h.bf16 %v3212_v6  ;;  %3261 = vmatprep.subr.msk.mxu0 %vm628_vm0, %v2925_v4  ;;  %v3203_v18 = vld [vmem:[%s3677_s21 + $0xb0] sm:$0xff]   ;;  %v2889_v19 = vunpack.c.h.bf16 %v3187_v15  ;;  %v2888_v25 = vunpack.c.l.bf16 %v3187_v15  ;;  %v3202_v30 = vld [vmem:[%s3677_s21 + $0xa8] sm:$0xff]  }
  0x1d   : > { %v2957_v11 = vunpack.c.h.bf16 %v3204_v7  ;;  %3262 = vmatpush3.xpose.msk.msra.mxu0 %vm628_vm0, %v2893_v5  ;;  %v2956_v16 = vunpack.c.l.bf16 %v3204_v7  ;;  %v2953_v21 = vunpack.c.h.bf16 %v3203_v18  ;;  %v2917_v26 = vunpack.c.h.bf16 %v3194_v22  ;;  %v3193_v34 = vld [vmem:[%s3677_s21 + $0x60] sm:$0xff]   ;;  %v3192_v46 = vld [vmem:[%s3677_s21 + $0x58] sm:$0xff]   ;;  %v3191_v60 = vld [vmem:[%s3677_s21 + $0x50] sm:$0xff]   ;;  %p3510_p13 = pneg %p3509_p12 }
  0x1e   : > { %3301 = vmatprep.subr.msk.mxu1 %vm628_vm0, %v2989_v10  ;;  %3263 = vmatprep.subr.msk.mxu0 %vm628_vm0, %v2924_v3  ;;  %v2952_v28 = vunpack.c.l.bf16 %v3203_v18  ;;  %v2981_v29 = vunpack.c.h.bf16 %v3210_v24  ;;  %v2885_v31 = vunpack.c.h.bf16 %v3186_v27  ;;  %v2916_v32 = vunpack.c.l.bf16 %v3194_v22  ;;  %v3209_v36 = vld [vmem:[%s3677_s21 + $0xe0] sm:$0xff]   ;;  %v3208_v48 = vld [vmem:[%s3677_s21 + $0xd8] sm:$0xff]   ;;  %v3207_v63 = vld [vmem:[%s3677_s21 + $0xd0] sm:$0xff]  }
  0x1f   : > { %3302 = vmatpush3.xpose.msk.msra.mxu1 %vm628_vm0, %v2957_v11  ;;  %v2949_v33 = vunpack.c.h.bf16 %v3202_v30  ;;  %v2980_v35 = vunpack.c.l.bf16 %v3210_v24  ;;  %v2884_v37 = vunpack.c.l.bf16 %v3186_v27  ;;  %v2913_v38 = vunpack.c.h.bf16 %v3193_v34  ;;  %v3185_v39 = vld [vmem:[%s3677_s21 + $0x20] sm:$0xff]   ;;  %v3184_v51 = vld [vmem:[%s3677_s21 + $0x18] sm:$0xff]   ;;  %v3183_v4 = vld [vmem:[%s3677_s21 + $0x10] sm:$0xff]   ;;  %p3517_p3 = pnand %p3516_p2, %p3510_p13 }
  0x20   : > { %3303 = vmatprep.subr.msk.mxu1 %vm628_vm0, %v2988_v9  ;;  %v2948_v40 = vunpack.c.l.bf16 %v3202_v30  ;;  %v2977_v41 = vunpack.c.h.bf16 %v3209_v36  ;;  %v3201_v42 = vld [vmem:[%s3677_s21 + $0xa0] sm:$0xff]   ;;  %v2881_v43 = vunpack.c.h.bf16 %v3185_v39  ;;  %v2912_v44 = vunpack.c.l.bf16 %v3193_v34  ;;  %v3200_v54 = vld [vmem:[%s3677_s21 + $0x98] sm:$0xff]   ;;  %v606_v6 = vld [vmem:[%s4266_s2 + $0x10] sm:$0xff] }
  0x21   : > { %3264 = vmatpush3.xpose.msk.msra.mxu0 %vm628_vm0, %v2892_v13  ;;  %v2945_v45 = vunpack.c.h.bf16 %v3201_v42  ;;  %v2976_v47 = vunpack.c.l.bf16 %v3209_v36  ;;  %v2880_v49 = vunpack.c.l.bf16 %v3185_v39  ;;  %v2909_v50 = vunpack.c.h.bf16 %v3192_v46  ;;  %v604_v2 = vld [vmem:[%s4266_s2] sm:$0xff]  ;;  %v3199_v8 = vld [vmem:[%s3677_s21 + $0x90] sm:$0xff]   ;;  %620 = vperm.xlu0 %3505, %v606_v6   ;;  %v3190_v12 = vld [vmem:[%s3677_s21 + $0x48] sm:$0xff]  }
  0x22   : > { %3265 = vmatprep.subr.msk.mxu0 %vm628_vm0, %v2921_v14  ;;  %v2944_v52 = vunpack.c.l.bf16 %v3201_v42  ;;  %v2973_v53 = vunpack.c.h.bf16 %v3208_v48  ;;  %v2877_v55 = vunpack.c.h.bf16 %v3184_v51  ;;  %v2908_v57 = vunpack.c.l.bf16 %v3192_v46  ;;  %610 = vperm.xlu1 %3506, %v604_v2   ;;  %v3206_v14 = vld [vmem:[%s3677_s21 + $0xc8] sm:$0xff]   ;;  %v3189_v24 = vld [vmem:[%s3677_s21 + $0x40] sm:$0xff]   ;;  %v3228_v36 = vld [vmem:[%s3677_s21 + $0x178] sm:$0xff]  }
  0x23   : > { %3304 = vmatpush3.xpose.msk.msra.mxu1 %vm628_vm0, %v2956_v16  ;;  %v2941_v58 = vunpack.c.h.bf16 %v3200_v54  ;;  %v2972_v61 = vunpack.c.l.bf16 %v3208_v48  ;;  %v2876_v1 = vunpack.c.l.bf16 %v3184_v51  ;;  %v2905_v3 = vunpack.c.h.bf16 %v3191_v60  ;;  %v3794_v46 = vld [vmem:[%s4265_s1 + $0x8] sm:$0xff]  ;;  %v3227_v48 = vld [vmem:[%s3677_s21 + $0x170] sm:$0xff]  }
  0x24   : > { %3305 = vmatprep.subr.msk.mxu1 %vm628_vm0, %v2985_v17  ;;  %v2940_v5 = vunpack.c.l.bf16 %v3200_v54  ;;  %v2969_v7 = vunpack.c.h.bf16 %v3207_v63  ;;  %v2873_v9 = vunpack.c.h.bf16 %v3183_v4  ;;  %v2904_v10 = vunpack.c.l.bf16 %v3191_v60  ;;  %v3182_v17 = vld [vmem:[%s3677_s21 + $0x8] sm:$0xff]   ;;  %v3828_v60 = vld [vmem:[%s4265_s1 + $0x18] sm:$0xff] }
  0x25   : > { %3266 = vmatpush3.xpose.msk.msra.mxu0 %vm628_vm0, %v2889_v19  ;;  %v2937_v11 = vunpack.c.h.bf16 %v3199_v8  ;;  %v2968_v13 = vunpack.c.l.bf16 %v3207_v63  ;;  %v2872_v15 = vunpack.c.l.bf16 %v3183_v4  ;;  %v2901_v16 = vunpack.c.h.bf16 %v3190_v12  ;;  %v3226_v62 = vld [vmem:[%s3677_s21 + $0x168] sm:$0xff]  }
  0x26   : > { %3267 = vmatprep.subr.msk.mxu0 %vm628_vm0, %v2920_v20  ;;  %v2936_v18 = vunpack.c.l.bf16 %v3199_v8  ;;  %v2965_v19 = vunpack.c.h.bf16 %v3206_v14  ;;  %v3198_v20 = vld [vmem:[%s3677_s21 + $0x88] sm:$0xff]   ;;  %v2900_v22 = vunpack.c.l.bf16 %v3190_v12  ;;  %v2868_v27 = vunpack.c.l.bf16 %v3182_v17  ;;  %v1612_v12 = vld [vmem:[%s4268_s4 + $0x10] sm:$0xff] }
  0x27   : > { %3306 = vmatpush3.xpose.msk.msra.mxu1 %vm628_vm0, %v2953_v21  ;;  %v2869_v21 = vunpack.c.h.bf16 %v3182_v17  ;;  %v2932_v30 = vunpack.c.l.bf16 %v3198_v20  ;;  %v2896_v34 = vunpack.c.l.bf16 %v3189_v24  ;;  %v3049_v54 = vunpack.c.h.bf16 %v3227_v48  ;;  %v3234_v8 = vld [vmem:[%s3677_s21 + $0x1a8] sm:$0xff]   ;;  %v3241_v17 = vld [vmem:[%s3677_s21 + $0x1e0] sm:$0xff]   ;;  %1626 = vperm.xlu1 %3506, %v1612_v12  }
  0x28   : > { %3307 = vmatprep.subr.msk.mxu1 %vm628_vm0, %v2984_v23  ;;  %v2933_v23 = vunpack.c.h.bf16 %v3198_v20  ;;  %v3045_v4 = vunpack.c.h.bf16 %v3226_v62  ;;  %v3217_v20 = vld [vmem:[%s3677_s21 + $0x120] sm:$0xff]  }
  0x29   : > { %3268 = vmatpush3.xpose.msk.msra.mxu0 %vm628_vm0, %v2888_v25  ;;  %v2964_v25 = vunpack.c.l.bf16 %v3206_v14  ;;  %v3077_v14 = vunpack.c.h.bf16 %v3234_v8  ;;  %v3229_v12 = vld [vmem:[%s3677_s21 + $0x180] sm:$0xff]  }
  0x2a   : > { %3269 = vmatprep.subr.msk.mxu0 %vm628_vm0, %v2917_v26  ;;  %v3205_v26 = vld [vmem:[%s3677_s21 + $0xc0] sm:$0xff]  }
  0x2b   : > { %3308 = vmatpush3.xpose.msk.msra.mxu1 %vm628_vm0, %v2952_v28  ;;  %v2897_v28 = vunpack.c.h.bf16 %v3189_v24  ;;  %v3233_v24 = vld [vmem:[%s3677_s21 + $0x1a0] sm:$0xff]  }
  0x2c   : > { %3309 = vmatprep.subr.msk.mxu1 %vm628_vm0, %v2981_v29  ;;  %v2863_v29 = vld [vmem:[%s3677_s21] sm:$0xff]  }
  0x2d   : > { %3270 = vmatpush3.xpose.msk.msra.mxu0 %vm628_vm0, %v2885_v31  ;;  %v2961_v31 = vunpack.c.h.bf16 %v3205_v26  ;;  %v2864_v39 = vunpack.c.l.bf16 %v2863_v29 }
  0x2e   : > { %3271 = vmatprep.subr.msk.mxu0 %vm628_vm0, %v2916_v32  ;;  %v3197_v32 = vld [vmem:[%s3677_s21 + $0x80] sm:$0xff]  }
  0x2f   : > { %3310 = vmatpush3.xpose.msk.msra.mxu1 %vm628_vm0, %v2949_v33  ;;  %v2865_v33 = vunpack.c.h.bf16 %v2863_v29  ;;  %v2928_v42 = vunpack.c.l.bf16 %v3197_v32  ;;  %v3104_v29 = vunpack.c.l.bf16 %v3241_v17 }
  0x30   : > { %3311 = vmatprep.subr.msk.mxu1 %vm628_vm0, %v2980_v35  ;;  %v2929_v35 = vunpack.c.h.bf16 %v3197_v32 }
  0x31   : > { %3272 = vmatpush3.xpose.msk.msra.mxu0 %vm628_vm0, %v2884_v37  ;;  %v2960_v37 = vunpack.c.l.bf16 %v3205_v26 }
  0x32   : > { %3273 = vmatprep.subr.msk.mxu0 %vm628_vm0, %v2913_v38  ;;  %v3244_v38 = vld [vmem:[%s3677_s21 + $0x1f8] sm:$0xff]  }
  0x33   : > { %3312 = vmatpush3.xpose.msk.msra.mxu1 %vm628_vm0, %v2948_v40  ;;  %v3053_v40 = vunpack.c.h.bf16 %v3228_v36 }
  0x34   : > { %3313 = vmatprep.subr.msk.mxu1 %vm628_vm0, %v2977_v41  ;;  %v3220_v41 = vld [vmem:[%s3677_s21 + $0x138] sm:$0xff]  }
  0x35   : > { %3274 = vmatpush3.xpose.msk.msra.mxu0 %vm628_vm0, %v2881_v43  ;;  %v3117_v43 = vunpack.c.h.bf16 %v3244_v38  ;;  %v3020_v51 = vunpack.c.l.bf16 %v3220_v41 }
  0x36   : > { %3275 = vmatprep.subr.msk.mxu0 %vm628_vm0, %v2912_v44  ;;  %v3236_v44 = vld [vmem:[%s3677_s21 + $0x1b8] sm:$0xff]  }
  0x37   : > { %3314 = vmatpush3.xpose.msk.msra.mxu1 %vm628_vm0, %v2945_v45  ;;  %v3021_v45 = vunpack.c.h.bf16 %v3220_v41  ;;  %v3084_v56 = vunpack.c.l.bf16 %v3236_v44 }
  0x38   : > { %3315 = vmatprep.subr.msk.mxu1 %vm628_vm0, %v2976_v47  ;;  %v3052_v47 = vunpack.c.l.bf16 %v3228_v36  ;;  %v3232_v36 = vld [vmem:[%s3677_s21 + $0x198] sm:$0xff]  }
  0x39   : > { %3276 = vmatpush3.xpose.msk.msra.mxu0 %vm628_vm0, %v2880_v49  ;;  %v3085_v49 = vunpack.c.h.bf16 %v3236_v44 }
  0x3a   : > { %3277 = vmatprep.subr.msk.mxu0 %vm628_vm0, %v2909_v50  ;;  %v3116_v50 = vunpack.c.l.bf16 %v3244_v38 }
  0x3b   : > { %3316 = vmatpush3.xpose.msk.msra.mxu1 %vm628_vm0, %v2944_v52  ;;  %v3243_v52 = vld [vmem:[%s3677_s21 + $0x1f0] sm:$0xff]  }
  0x3c   : > { %3317 = vmatprep.subr.msk.mxu1 %vm628_vm0, %v2973_v53  ;;  %v3809_v53 = vld [vmem:[%s4265_s1 + $0x10] sm:$0xff] }
  0x3d   : > { %3278 = vmatpush3.xpose.msk.msra.mxu0 %vm628_vm0, %v2877_v55  ;;  %v3219_v55 = vld [vmem:[%s3677_s21 + $0x130] sm:$0xff]  }
  0x3e   : > { %3279 = vmatprep.subr.msk.mxu0 %vm628_vm0, %v2908_v57  ;;  %v3113_v57 = vunpack.c.h.bf16 %v3243_v52  ;;  %v3017_v59 = vunpack.c.h.bf16 %v3219_v55  ;;  %v3016_v2 = vunpack.c.l.bf16 %v3219_v55 }
  0x3f   : > { %3318 = vmatpush3.xpose.msk.msra.mxu1 %vm628_vm0, %v2941_v58  ;;  %v3235_v58 = vld [vmem:[%s3677_s21 + $0x1b0] sm:$0xff]  }
  0x40   : > { %3319 = vmatprep.subr.msk.mxu1 %vm628_vm0, %v2972_v61  ;;  %v3048_v61 = vunpack.c.l.bf16 %v3227_v48  ;;  %v3081_v63 = vunpack.c.h.bf16 %v3235_v58  ;;  %v3080_v6 = vunpack.c.l.bf16 %v3235_v58 }
  0x41   : > { %3280 = vmatpush3.xpose.msk.msra.mxu0 %vm628_vm0, %v2876_v1  ;;  %v3112_v1 = vunpack.c.l.bf16 %v3243_v52  ;;  %v3222_v52 = vld [vmem:[%s3677_s21 + $0x148] sm:$0xff]  }
  0x42   : > { %3281 = vmatprep.subr.msk.mxu0 %vm628_vm0, %v2905_v3  ;;  %v3242_v3 = vld [vmem:[%s3677_s21 + $0x1e8] sm:$0xff]   ;;  %v3029_v58 = vunpack.c.h.bf16 %v3222_v52 }
  0x43   : > { %3320 = vmatpush3.xpose.msk.msra.mxu1 %vm628_vm0, %v2940_v5  ;;  %v3218_v5 = vld [vmem:[%s3677_s21 + $0x128] sm:$0xff]  }
  0x44   : > { %3321 = vmatprep.subr.msk.mxu1 %vm628_vm0, %v2969_v7  ;;  %v3109_v7 = vunpack.c.h.bf16 %v3242_v3 }
  0x45   : > { %3282 = vmatpush3.xpose.msk.msra.mxu0 %vm628_vm0, %v2873_v9  ;;  %v3013_v9 = vunpack.c.h.bf16 %v3218_v5 }
  0x46   : > { %3283 = vmatprep.subr.msk.mxu0 %vm628_vm0, %v2904_v10  ;;  %v1613_v10 = vld [vmem:[%s4268_s4 + $0x18] sm:$0xff] }
  0x47   : > { %3322 = vmatpush3.xpose.msk.msra.mxu1 %vm628_vm0, %v2937_v11  ;;  %v3044_v11 = vunpack.c.l.bf16 %v3226_v62  ;;  %1631 = vperm.xlu0 %3505, %v1613_v10  }
  0x48   : > { %3323 = vmatprep.subr.msk.mxu1 %vm628_vm0, %v2968_v13  ;;  %v3225_v13 = vld [vmem:[%s3677_s21 + $0x160] sm:$0xff]  }
  0x49   : > { %3284 = vmatpush3.xpose.msk.msra.mxu0 %vm628_vm0, %v2872_v15  ;;  %v3108_v15 = vunpack.c.l.bf16 %v3242_v3  ;;  %v3040_v26 = vunpack.c.l.bf16 %v3225_v13  ;;  %v3221_v3 = vld [vmem:[%s3677_s21 + $0x140] sm:$0xff]  }
  0x4a   : > { %3285 = vmatprep.subr.msk.mxu0 %vm628_vm0, %v2901_v16  ;;  %v3012_v16 = vunpack.c.l.bf16 %v3218_v5 }
  0x4b   : > { %3324 = vmatpush3.xpose.msk.msra.mxu1 %vm628_vm0, %v2936_v18  ;;  %v1611_v18 = vld [vmem:[%s4268_s4 + $0x8] sm:$0xff] }
  0x4c   : > { %3325 = vmatprep.subr.msk.mxu1 %vm628_vm0, %v2965_v19  ;;  %v3041_v19 = vunpack.c.h.bf16 %v3225_v13  ;;  %1621 = vperm.xlu0 %3505, %v1611_v18  }
  0x4d   : > { %3286 = vmatpush3.xpose.msk.msra.mxu0 %vm628_vm0, %v2869_v21  ;;  %v1610_v21 = vld [vmem:[%s4268_s4] sm:$0xff] }
  0x4e   : > { %3287 = vmatprep.subr.msk.mxu0 %vm628_vm0, %v2900_v22  ;;  %v3076_v22 = vunpack.c.l.bf16 %v3234_v8  ;;  %1616 = vperm.xlu1 %3506, %v1610_v21   ;;  %v3025_v8 = vunpack.c.h.bf16 %v3221_v3  ;;  %v3056_v21 = vunpack.c.l.bf16 %v3229_v12 }
  0x4f   : > { %3326 = vmatpush3.xpose.msk.msra.mxu1 %vm628_vm0, %v2933_v23  ;;  %v3105_v23 = vunpack.c.h.bf16 %v3241_v17 }
  0x50   : > { %3327 = vmatprep.subr.msk.mxu1 %vm628_vm0, %v2964_v25  ;;  %v3009_v25 = vunpack.c.h.bf16 %v3217_v20 }
  0x51   : > { %3288 = vmatpush3.xpose.msk.msra.mxu0 %vm628_vm0, %v2868_v27  ;;  %v3224_v27 = vld [vmem:[%s3677_s21 + $0x158] sm:$0xff]  }
  0x52   : > { %3289 = vmatprep.subr.msk.mxu0 %vm628_vm0, %v2897_v28  ;;  %v3073_v28 = vunpack.c.h.bf16 %v3233_v24  ;;  %v3037_v32 = vunpack.c.h.bf16 %v3224_v27  ;;  %v3036_v38 = vunpack.c.l.bf16 %v3224_v27  ;;  %v3251_v27 = vld [vmem:[%s3677_s21 + $0x230] sm:$0xff]  }
  0x53   : > { %3328 = vmatpush3.xpose.msk.msra.mxu1 %vm628_vm0, %v2932_v30  ;;  %v3008_v30 = vunpack.c.l.bf16 %v3217_v20  ;;  %v3252_v20 = vld [vmem:[%s3677_s21 + $0x238] sm:$0xff]  }
  0x54   : > { %3329 = vmatprep.subr.msk.mxu1 %vm628_vm0, %v2961_v31  ;;  %v3240_v31 = vld [vmem:[%s3677_s21 + $0x1d8] sm:$0xff]  }
  0x55   : > { %3290 = vmatpush3.xpose.msk.msra.mxu0 %vm628_vm0, %v2865_v33  ;;  %v3216_v33 = vld [vmem:[%s3677_s21 + $0x118] sm:$0xff]   ;;  %v3100_v41 = vunpack.c.l.bf16 %v3240_v31 }
  0x56   : > { %3291 = vmatprep.subr.msk.mxu0 %vm628_vm0, %v2896_v34  ;;  %v3072_v34 = vunpack.c.l.bf16 %v3233_v24  ;;  %v3259_v24 = vld [vmem:[%s3677_s21 + $0x270] sm:$0xff]  }
  0x57   : > { %3330 = vmatpush3.xpose.msk.msra.mxu1 %vm628_vm0, %v2929_v35  ;;  %v3101_v35 = vunpack.c.h.bf16 %v3240_v31  ;;  %v3144_v31 = vunpack.c.l.bf16 %v3251_v27 }
  0x58   : > { %3331 = vmatprep.subr.msk.mxu1 %vm628_vm0, %v2960_v37  ;;  %v3005_v37 = vunpack.c.h.bf16 %v3216_v33 }
  0x59   : > { %3292 = vmatpush3.xpose.msk.msra.mxu0 %vm628_vm0, %v2864_v39  ;;  %v3223_v39 = vld [vmem:[%s3677_s21 + $0x150] sm:$0xff]  }
  0x5a   : > { %3341 = vmatprep.subr.msk.mxu0 %vm628_vm0, %v3053_v40  ;;  %v3069_v40 = vunpack.c.h.bf16 %v3232_v36  ;;  %v3033_v44 = vunpack.c.h.bf16 %v3223_v39 }
  0x5b   : > { %3332 = vmatpush3.xpose.msk.msra.mxu1 %vm628_vm0, %v2928_v42  ;;  %v3004_v42 = vunpack.c.l.bf16 %v3216_v33  ;;  %v3250_v33 = vld [vmem:[%s3677_s21 + $0x228] sm:$0xff]  }
  0x5c   : > { %3381 = vmatprep.subr.msk.mxu1 %vm628_vm0, %v3117_v43  ;;  %3294 = vmatmul.mubr.msk.f32.vlgmr.msra.gmra.mxu0 %vm628_vm0, %v3666_v0  ;;  %v3239_v43 = vld [vmem:[%s3677_s21 + $0x1d0] sm:$0xff]  }
  0x5d   : > { %3342 = vmatpush3.xpose.msk.msra.mxu0 %vm628_vm0, %v3021_v45  ;;  %3295 = vmatprep.mubr.msk.f32.mxu0 %vm628_vm0, %v3794_v46  ;;  %v3215_v45 = vld [vmem:[%s3677_s21 + $0x110] sm:$0xff]   ;;  %v3097_v48 = vunpack.c.h.bf16 %v3239_v43  ;;  %v3096_v55 = vunpack.c.l.bf16 %v3239_v43 }
  0x5e   : > { %3343 = vmatprep.subr.msk.mxu0 %vm628_vm0, %v3052_v47  ;;  %3334 = vmatmul.mubr.msk.f32.vlgmr.msra.gmra.mxu1 %vm628_vm0, %v3666_v0  ;;  %v3068_v47 = vunpack.c.l.bf16 %v3232_v36  ;;  %v3257_v36 = vld [vmem:[%s3677_s21 + $0x260] sm:$0xff]  }
  0x5f   : > { %3382 = vmatpush3.xpose.msk.msra.mxu1 %vm628_vm0, %v3085_v49  ;;  %3335 = vmatprep.mubr.msk.f32.mxu1 %vm628_vm0, %v3794_v46  ;;  %v3231_v49 = vld [vmem:[%s3677_s21 + $0x190] sm:$0xff]  }
  0x60   : > { %3296 = vmatmul.mubr.msk.f32.gmra.mxu0 %vm628_vm0, %v3794_v46  ;;  %3383 = vmatprep.subr.msk.mxu1 %vm628_vm0, %v3116_v50  ;;  %v3001_v50 = vunpack.c.h.bf16 %v3215_v45 }
  0x61   : > { %3344 = vmatpush3.xpose.msk.msra.mxu0 %vm628_vm0, %v3020_v51  ;;  %3297 = vmatprep.mubr.msk.f32.mxu0 %vm628_vm0, %v3809_v53  ;;  %v3032_v51 = vunpack.c.l.bf16 %v3223_v39  ;;  %v3249_v39 = vld [vmem:[%s3677_s21 + $0x220] sm:$0xff]  }
  0x62   : > { %3345 = vmatprep.subr.msk.mxu0 %vm628_vm0, %v3049_v54  ;;  %3336 = vmatmul.mubr.msk.f32.gmra.mxu1 %vm628_vm0, %v3794_v46  ;;  %v3065_v54 = vunpack.c.h.bf16 %v3231_v49  ;;  %v3136_v43 = vunpack.c.l.bf16 %v3249_v39 }
  0x63   : > { %3384 = vmatpush3.xpose.msk.msra.mxu1 %vm628_vm0, %v3084_v56  ;;  %3337 = vmatprep.mubr.msk.f32.mxu1 %vm628_vm0, %v3809_v53  ;;  %v3000_v56 = vunpack.c.l.bf16 %v3215_v45  ;;  %v3248_v45 = vld [vmem:[%s3677_s21 + $0x218] sm:$0xff]  }
  0x64   : > { %3298 = vmatmul.mubr.msk.f32.gmra.mxu0 %vm628_vm0, %v3809_v53  ;;  %3385 = vmatprep.subr.msk.mxu1 %vm628_vm0, %v3113_v57  ;;  %v3238_v57 = vld [vmem:[%s3677_s21 + $0x1c8] sm:$0xff]  }
  0x65   : > { %3346 = vmatpush3.xpose.msk.msra.mxu0 %vm628_vm0, %v3017_v59  ;;  %3299 = vmatprep.mubr.msk.f32.mxu0 %vm628_vm0, %v3828_v60  ;;  %v3214_v59 = vld [vmem:[%s3677_s21 + $0x108] sm:$0xff]   ;;  %v3093_v62 = vunpack.c.h.bf16 %v3238_v57  ;;  %v3092_v5 = vunpack.c.l.bf16 %v3238_v57 }
  0x66   : > { %3347 = vmatprep.subr.msk.mxu0 %vm628_vm0, %v3048_v61  ;;  %3338 = vmatmul.mubr.msk.f32.gmra.mxu1 %vm628_vm0, %v3809_v53  ;;  %v3064_v61 = vunpack.c.l.bf16 %v3231_v49  ;;  %v3254_v57 = vld [vmem:[%s3677_s21 + $0x248] sm:$0xff]  }
  0x67   : > { %3386 = vmatpush3.xpose.msk.msra.mxu1 %vm628_vm0, %v3081_v63  ;;  %3339 = vmatprep.mubr.msk.f32.mxu1 %vm628_vm0, %v3828_v60  ;;  %v3230_v63 = vld [vmem:[%s3677_s21 + $0x188] sm:$0xff]  }
  0x68   : > { %3300 = vmatmul.mubr.msk.f32.gmra.mxu0 %vm628_vm0, %v3828_v60  ;;  %3387 = vmatprep.subr.msk.mxu1 %vm628_vm0, %v3112_v1  ;;  %v2997_v1 = vunpack.c.h.bf16 %v3214_v59  ;;  %v3060_v10 = vunpack.c.l.bf16 %v3230_v63 }
  0x69   : > { %3348 = vmatpush3.xpose.msk.msra.mxu0 %vm628_vm0, %v3016_v2  ;;  %3373 = vmatprep.mubr.msk.f32.mxu0 %vm628_vm0, %v3666_v0  ;;  %v3028_v2 = vunpack.c.l.bf16 %v3222_v52 }
  0x6a   : > { %3349 = vmatprep.subr.msk.mxu0 %vm628_vm0, %v3045_v4  ;;  %3340 = vmatmul.mubr.msk.f32.gmra.mxu1 %vm628_vm0, %v3828_v60  ;;  %v3061_v4 = vunpack.c.h.bf16 %v3230_v63  ;;  %v3156_v63 = vunpack.c.l.bf16 %v3254_v57 }
  0x6b   : > { %3388 = vmatpush3.xpose.msk.msra.mxu1 %vm628_vm0, %v3080_v6  ;;  %3413 = vmatprep.mubr.msk.f32.mxu1 %vm628_vm0, %v3666_v0  ;;  %v2996_v6 = vunpack.c.l.bf16 %v3214_v59  ;;  %v3157_v59 = vunpack.c.h.bf16 %v3254_v57 }
  0x6c   : > { %3389 = vmatprep.subr.msk.mxu1 %vm628_vm0, %v3109_v7  ;;  %v3237_v7 = vld [vmem:[%s3677_s21 + $0x1c0] sm:$0xff]  }
  0x6d   : > { %3350 = vmatpush3.xpose.msk.msra.mxu0 %vm628_vm0, %v3013_v9  ;;  %v3213_v9 = vld [vmem:[%s3677_s21 + $0x100] sm:$0xff]   ;;  %v3088_v17 = vunpack.c.l.bf16 %v3237_v7 }
  0x6e   : > { %3351 = vmatprep.subr.msk.mxu0 %vm628_vm0, %v3044_v11  ;;  %v3089_v11 = vunpack.c.h.bf16 %v3237_v7  ;;  %v2993_v13 = vunpack.c.h.bf16 %v3213_v9  ;;  %v2992_v18 = vunpack.c.l.bf16 %v3213_v9 }
  0x6f   : > { %3390 = vmatpush3.xpose.msk.msra.mxu1 %vm628_vm0, %v3077_v14  ;;  %v3024_v14 = vunpack.c.l.bf16 %v3221_v3 }
  0x70   : > { %3391 = vmatprep.subr.msk.mxu1 %vm628_vm0, %v3108_v15  ;;  %v3260_v15 = vld [vmem:[%s3677_s21 + $0x278] sm:$0xff]  }
  0x71   : > { %3352 = vmatpush3.xpose.msk.msra.mxu0 %vm628_vm0, %v3012_v16  ;;  %v3057_v16 = vunpack.c.h.bf16 %v3229_v12 }
  0x72   : > { %3353 = vmatprep.subr.msk.mxu0 %vm628_vm0, %v3041_v19  ;;  %v3181_v19 = vunpack.c.h.bf16 %v3260_v15 }
  0x73   : > { %3392 = vmatpush3.xpose.msk.msra.mxu1 %vm628_vm0, %v3076_v22  ;;  %v3149_v22 = vunpack.c.h.bf16 %v3252_v20 }
  0x74   : > { %3393 = vmatprep.subr.msk.mxu1 %vm628_vm0, %v3105_v23  ;;  %v3180_v23 = vunpack.c.l.bf16 %v3260_v15 }
  0x75   : > { %3354 = vmatpush3.xpose.msk.msra.mxu0 %vm628_vm0, %v3009_v25  ;;  %v3148_v25 = vunpack.c.l.bf16 %v3252_v20 }
  0x76   : > { %3355 = vmatprep.subr.msk.mxu0 %vm628_vm0, %v3040_v26  ;;  %v3177_v26 = vunpack.c.h.bf16 %v3259_v24 }
  0x77   : > { %3394 = vmatpush3.xpose.msk.msra.mxu1 %vm628_vm0, %v3073_v28  ;;  %v3145_v28 = vunpack.c.h.bf16 %v3251_v27 }
  0x78   : > { %3395 = vmatprep.subr.msk.mxu1 %vm628_vm0, %v3104_v29  ;;  %v3176_v29 = vunpack.c.l.bf16 %v3259_v24 }
  0x79   : > { %3356 = vmatpush3.xpose.msk.msra.mxu0 %vm628_vm0, %v3008_v30  ;;  %v3258_v30 = vld [vmem:[%s3677_s21 + $0x268] sm:$0xff]  }
  0x7a   : > { %3357 = vmatprep.subr.msk.mxu0 %vm628_vm0, %v3037_v32  ;;  %v3173_v32 = vunpack.c.h.bf16 %v3258_v30 }
  0x7b   : > { %3396 = vmatpush3.xpose.msk.msra.mxu1 %vm628_vm0, %v3072_v34  ;;  %v3141_v34 = vunpack.c.h.bf16 %v3250_v33 }
  0x7c   : > { %3397 = vmatprep.subr.msk.mxu1 %vm628_vm0, %v3101_v35  ;;  %v3172_v35 = vunpack.c.l.bf16 %v3258_v30 }
  0x7d   : > { %3358 = vmatpush3.xpose.msk.msra.mxu0 %vm628_vm0, %v3005_v37  ;;  %v3140_v37 = vunpack.c.l.bf16 %v3250_v33 }
  0x7e   : > { %3359 = vmatprep.subr.msk.mxu0 %vm628_vm0, %v3036_v38  ;;  %v3169_v38 = vunpack.c.h.bf16 %v3257_v36 }
  0x7f   : > { %3398 = vmatpush3.xpose.msk.msra.mxu1 %vm628_vm0, %v3069_v40  ;;  %v3137_v40 = vunpack.c.h.bf16 %v3249_v39 }
  0x80   : > { %3399 = vmatprep.subr.msk.mxu1 %vm628_vm0, %v3100_v41  ;;  %v3168_v41 = vunpack.c.l.bf16 %v3257_v36 }
  0x81   : > { %3360 = vmatpush3.xpose.msk.msra.mxu0 %vm628_vm0, %v3004_v42  ;;  %v3256_v42 = vld [vmem:[%s3677_s21 + $0x258] sm:$0xff]  }
  0x82   : > { %3361 = vmatprep.subr.msk.mxu0 %vm628_vm0, %v3033_v44  ;;  %v3165_v44 = vunpack.c.h.bf16 %v3256_v42  ;;  %v3164_v49 = vunpack.c.l.bf16 %v3256_v42 }
  0x83   : > { %3400 = vmatpush3.xpose.msk.msra.mxu1 %vm628_vm0, %v3068_v47  ;;  %v3570_v47 = vmov 0.0  }
  0x84   : > { %3401 = vmatprep.subr.msk.mxu1 %vm628_vm0, %v3097_v48  ;;  %v3133_v48 = vunpack.c.h.bf16 %v3248_v45 }
  0x85   : > { %3362 = vmatpush3.xpose.msk.msra.mxu0 %vm628_vm0, %v3001_v50  ;;  %v3255_v50 = vld [vmem:[%s3677_s21 + $0x250] sm:$0xff]  }
  0x86   : > { %3363 = vmatprep.subr.msk.mxu0 %vm628_vm0, %v3032_v51  ;;  %v3132_v51 = vunpack.c.l.bf16 %v3248_v45  ;;  %v3161_v52 = vunpack.c.h.bf16 %v3255_v50 }
  0x87   : > { %3402 = vmatpush3.xpose.msk.msra.mxu1 %vm628_vm0, %v3065_v54  ;;  %v3247_v54 = vld [vmem:[%s3677_s21 + $0x210] sm:$0xff]  }
  0x88   : > { %3403 = vmatprep.subr.msk.mxu1 %vm628_vm0, %v3096_v55  ;;  %v3129_v55 = vunpack.c.h.bf16 %v3247_v54 }
  0x89   : > { %3364 = vmatpush3.xpose.msk.msra.mxu0 %vm628_vm0, %v3000_v56  ;;  %v3160_v56 = vunpack.c.l.bf16 %v3255_v50 }
  0x8a   : > { %3365 = vmatprep.subr.msk.mxu0 %vm628_vm0, %v3029_v58  ;;  %v3128_v58 = vunpack.c.l.bf16 %v3247_v54 }
  0x8b   : > { %3404 = vmatpush3.xpose.msk.msra.mxu1 %vm628_vm0, %v3064_v61  ;;  %v3246_v61 = vld [vmem:[%s3677_s21 + $0x208] sm:$0xff]  }
  0x8c   : > { %3405 = vmatprep.subr.msk.mxu1 %vm628_vm0, %v3093_v62  ;;  %v3125_v62 = vunpack.c.h.bf16 %v3246_v61 }
  0x8d   : > { %3366 = vmatpush3.xpose.msk.msra.mxu0 %vm628_vm0, %v2997_v1  ;;  %v3253_v1 = vld [vmem:[%s3677_s21 + $0x240] sm:$0xff]  }
  0x8e   : > { %3367 = vmatprep.subr.msk.mxu0 %vm628_vm0, %v3028_v2  ;;  %v3124_v2 = vunpack.c.l.bf16 %v3246_v61  ;;  %v3153_v3 = vunpack.c.h.bf16 %v3253_v1 }
  0x8f   : > { %3406 = vmatpush3.xpose.msk.msra.mxu1 %vm628_vm0, %v3061_v4  ;;  %v3245_v4 = vld [vmem:[%s3677_s21 + $0x200] sm:$0xff]  }
  0x90   : > { %3407 = vmatprep.subr.msk.mxu1 %vm628_vm0, %v3092_v5  ;;  %v3121_v5 = vunpack.c.h.bf16 %v3245_v4  ;;  %v3120_v7 = vunpack.c.l.bf16 %v3245_v4 }
  0x91   : > { %3368 = vmatpush3.xpose.msk.msra.mxu0 %vm628_vm0, %v2996_v6  ;;  %v3152_v6 = vunpack.c.l.bf16 %v3253_v1 }
  0x92   : > { %3369 = vmatprep.subr.msk.mxu0 %vm628_vm0, %v3025_v8 }
  0x93   : > { %3408 = vmatpush3.xpose.msk.msra.mxu1 %vm628_vm0, %v3060_v10  ;;  %v4036_v10 = vpop.permute.xlu0 %625 }
  0x94   : > { %3409 = vmatprep.subr.msk.mxu1 %vm628_vm0, %v3089_v11 }
  0x95   : > { %3370 = vmatpush3.xpose.msk.msra.mxu0 %vm628_vm0, %v2993_v13 }
  0x96   : > { %3371 = vmatprep.subr.msk.mxu0 %vm628_vm0, %v3024_v14 }
  0x97   : > { %3410 = vmatpush3.xpose.msk.msra.mxu1 %vm628_vm0, %v3057_v16 }
  0x98   : > { %3411 = vmatprep.subr.msk.mxu1 %vm628_vm0, %v3088_v17 }
  0x99   : > { %3372 = vmatpush3.xpose.msk.msra.mxu0 %vm628_vm0, %v2992_v18 }
  0x9a   : > { %3421 = vmatprep.subr.msk.mxu0 %vm628_vm0, %v3181_v19 }
  0x9b   : > { %3412 = vmatpush3.xpose.msk.msra.mxu1 %vm628_vm0, %v3056_v21 }
  0x9c   : > { %3374 = vmatmul.mubr.msk.f32.vlgmr.msra.gmra.mxu0 %vm628_vm0, %v3666_v0  ;;  %v4040_v16 = vpop.permute.xlu0 %620 }
  0x9d   : > { %3422 = vmatpush3.xpose.msk.msra.mxu0 %vm628_vm0, %v3149_v22  ;;  %3375 = vmatprep.mubr.msk.f32.mxu0 %vm628_vm0, %v3794_v46 }
  0x9e   : > { %3423 = vmatprep.subr.msk.mxu0 %vm628_vm0, %v3180_v23  ;;  %3414 = vmatmul.mubr.msk.f32.vlgmr.msra.gmra.mxu1 %vm628_vm0, %v3666_v0 }
  0x9f   : > { %3415 = vmatprep.mubr.msk.f32.mxu1 %vm628_vm0, %v3794_v46 }
  0xa0   : > { %3376 = vmatmul.mubr.msk.f32.gmra.mxu0 %vm628_vm0, %v3794_v46 }
  0xa1   : > { %3424 = vmatpush3.xpose.msk.msra.mxu0 %vm628_vm0, %v3148_v25  ;;  %3377 = vmatprep.mubr.msk.f32.mxu0 %vm628_vm0, %v3809_v53 }
  0xa2   : > { %3425 = vmatprep.subr.msk.mxu0 %vm628_vm0, %v3177_v26  ;;  %3416 = vmatmul.mubr.msk.f32.gmra.mxu1 %vm628_vm0, %v3794_v46 }
  0xa3   : > { %3417 = vmatprep.mubr.msk.f32.mxu1 %vm628_vm0, %v3809_v53 }
  0xa4   : > { %3378 = vmatmul.mubr.msk.f32.gmra.mxu0 %vm628_vm0, %v3809_v53 }
  0xa5   : > { %3426 = vmatpush3.xpose.msk.msra.mxu0 %vm628_vm0, %v3145_v28  ;;  %3379 = vmatprep.mubr.msk.f32.mxu0 %vm628_vm0, %v3828_v60 }
  0xa6   : > { %3427 = vmatprep.subr.msk.mxu0 %vm628_vm0, %v3176_v29  ;;  %3418 = vmatmul.mubr.msk.f32.gmra.mxu1 %vm628_vm0, %v3809_v53 }
  0xa7   : > { %3419 = vmatprep.mubr.msk.f32.mxu1 %vm628_vm0, %v3828_v60 }
  0xa8   : > { %3380 = vmatmul.mubr.msk.f32.gmra.mxu0 %vm628_vm0, %v3828_v60 }
  0xa9   : > { %3428 = vmatpush3.xpose.msk.msra.mxu0 %vm628_vm0, %v3144_v31  ;;  %3453 = vmatprep.mubr.msk.f32.mxu0 %vm628_vm0, %v3666_v0 }
  0xaa   : > { %3429 = vmatprep.subr.msk.mxu0 %vm628_vm0, %v3173_v32  ;;  %3420 = vmatmul.mubr.msk.f32.gmra.mxu1 %vm628_vm0, %v3828_v60 }
  0xab   : > { %1711 = vmatprep.mubr.f32.mxu1 %v3570_v47 }
  0xad   : > { %3430 = vmatpush3.xpose.msk.msra.mxu0 %vm628_vm0, %v3141_v34 }
  0xae   : > { %3431 = vmatprep.subr.msk.mxu0 %vm628_vm0, %v3172_v35 }
  0xb1   : > { %3432 = vmatpush3.xpose.msk.msra.mxu0 %vm628_vm0, %v3140_v37 }
  0xb2   : > { %3433 = vmatprep.subr.msk.mxu0 %vm628_vm0, %v3169_v38 }
  0xb5   : > { %3434 = vmatpush3.xpose.msk.msra.mxu0 %vm628_vm0, %v3137_v40 }
  0xb6   : > { %3435 = vmatprep.subr.msk.mxu0 %vm628_vm0, %v3168_v41 }
  0xb9   : > { %3436 = vmatpush3.xpose.msk.msra.mxu0 %vm628_vm0, %v3136_v43 }
  0xba   : > { %3437 = vmatprep.subr.msk.mxu0 %vm628_vm0, %v3165_v44 }
  0xbd   : > { %3438 = vmatpush3.xpose.msk.msra.mxu0 %vm628_vm0, %v3133_v48 }
  0xbe   : > { %3439 = vmatprep.subr.msk.mxu0 %vm628_vm0, %v3164_v49  ;;  %v4061_v49 = vld [vmem:[%s4267_s3] sm:$0xff] }
  0xc1   : > { %3440 = vmatpush3.xpose.msk.msra.mxu0 %vm628_vm0, %v3132_v51 }
  0xc2   : > { %3441 = vmatprep.subr.msk.mxu0 %vm628_vm0, %v3161_v52 }
  0xc5   : > { %3442 = vmatpush3.xpose.msk.msra.mxu0 %vm628_vm0, %v3129_v55 }
  0xc6   : > { %3443 = vmatprep.subr.msk.mxu0 %vm628_vm0, %v3160_v56 }
  0xc9   : > { %3444 = vmatpush3.xpose.msk.msra.mxu0 %vm628_vm0, %v3128_v58  ;;  %v4071_v58 = vld [vmem:[%s4267_s3 + $0x8] sm:$0xff] }
  0xca   : > { %3445 = vmatprep.subr.msk.mxu0 %vm628_vm0, %v3157_v59 }
  0xcd   : > { %3446 = vmatpush3.xpose.msk.msra.mxu0 %vm628_vm0, %v3125_v62  ;;  %v4079_v62 = vld [vmem:[%s4267_s3 + $0x10] sm:$0xff] }
  0xce   : > { %3447 = vmatprep.subr.msk.mxu0 %vm628_vm0, %v3156_v63  ;;  %v4087_v63 = vld [vmem:[%s4267_s3 + $0x18] sm:$0xff] }
  0xd1   : > { %3448 = vmatpush3.xpose.msk.msra.mxu0 %vm628_vm0, %v3124_v2 }
  0xd2   : > { %3449 = vmatprep.subr.msk.mxu0 %vm628_vm0, %v3153_v3 }
  0xd5   : > { %3450 = vmatpush3.xpose.msk.msra.mxu0 %vm628_vm0, %v3121_v5 }
  0xd6   : > { %3451 = vmatprep.subr.msk.mxu0 %vm628_vm0, %v3152_v6 }
  0xd9   : > { %3452 = vmatpush3.xpose.msk.msra.mxu0 %vm628_vm0, %v3120_v7 }
  0xdc   : > { %3454 = vmatmul.mubr.msk.f32.vlgmr.msra.gmra.mxu0 %vm628_vm0, %v3666_v0 }
  0xdd   : > { %3455 = vmatprep.mubr.msk.f32.mxu0 %vm628_vm0, %v3794_v46 }
  0xe0   : > { %3456 = vmatmul.mubr.msk.f32.gmra.mxu0 %vm628_vm0, %v3794_v46 }
  0xe1   : > { %3457 = vmatprep.mubr.msk.f32.mxu0 %vm628_vm0, %v3809_v53 }
  0xe4   : > { %3458 = vmatmul.mubr.msk.f32.gmra.mxu0 %vm628_vm0, %v3809_v53  ;;  %v4038_v53 = vpop.permute.xlu1 %615 }
  0xe5   : > { %3459 = vmatprep.mubr.msk.f32.mxu0 %vm628_vm0, %v3828_v60 }
  0xe8   : > { %3460 = vmatmul.mubr.msk.f32.gmra.mxu0 %vm628_vm0, %v3828_v60  ;;  %v4047_v27 = vpop.permute.xlu1 %610 }
  0xe9   : > { %2067 = vmatprep.mubr.f32.mxu0 %v3570_v47 }
 0x11c   : > { %v1187_v0 = vpop.f32.mrf.mxu0 }
 0x11d   : > { %v1188_v38 = vadd.f32 %v1187_v0, %v4047_v27 }
 0x11e   : > { %v1189_v8 = vpop.f32.mrf.mxu0  ;;  %v1276_v9 = vpop.f32.mrf.mxu1 }
 0x11f   : > { %v1190_v34 = vadd.f32 %v1189_v8, %v4047_v27  ;;  %v1566_v48 = vmax.f32 %v1188_v38, 0.0  ;;  %v1277_v54 = vadd.f32 %v1276_v9, %v4047_v27 }
 0x120   : > { %v1193_v46 = vpop.f32.mrf.mxu0  ;;  %v1278_v11 = vpop.f32.mrf.mxu1 }
 0x121   : > { %v1194_v28 = vadd.f32 %v1193_v46, %v4038_v53  ;;  %v1567_v42 = vmax.f32 %v1190_v34, 0.0  ;;  %v1279_v51 = vadd.f32 %v1278_v11, %v4047_v27  ;;  %v1568_v61 = vmax.f32 %v1277_v54, 0.0 }
 0x122   : > { %v1195_v12 = vpop.f32.mrf.mxu0  ;;  %v1282_v13 = vpop.f32.mrf.mxu1 }
 0x123   : > { %v1196_v25 = vadd.f32 %v1195_v12, %v4038_v53  ;;  %v1576_v37 = vmax.f32 %v1194_v28, 0.0  ;;  %v1283_v45 = vadd.f32 %v1282_v13, %v4038_v53  ;;  %v1569_v59 = vmax.f32 %v1279_v51, 0.0 }
 0x124   : > { %v1199_v14 = vpop.f32.mrf.mxu0  ;;  %v1284_v15 = vpop.f32.mrf.mxu1 }
 0x125   : > { %v1200_v23 = vadd.f32 %v1199_v14, %v4040_v16  ;;  %v1577_v35 = vmax.f32 %v1196_v25, 0.0  ;;  %v1285_v43 = vadd.f32 %v1284_v15, %v4038_v53  ;;  %v1578_v57 = vmax.f32 %v1283_v45, 0.0 }
 0x126   : > { %v1201_v17 = vpop.f32.mrf.mxu0  ;;  %v1288_v18 = vpop.f32.mrf.mxu1 }
 0x127   : > { %v1202_v21 = vadd.f32 %v1201_v17, %v4040_v16  ;;  %v1586_v33 = vmax.f32 %v1200_v23, 0.0  ;;  %v1289_v41 = vadd.f32 %v1288_v18, %v4040_v16  ;;  %v1579_v56 = vmax.f32 %v1285_v43, 0.0 }
 0x128   : > { %v1205_v60 = vpop.f32.mrf.mxu0  ;;  %v1290_v19 = vpop.f32.mrf.mxu1 }
 0x129   : > { %v1206_v20 = vadd.f32 %v1205_v60, %v4036_v10  ;;  %v1587_v32 = vmax.f32 %v1202_v21, 0.0  ;;  %v1291_v40 = vadd.f32 %v1290_v19, %v4040_v16  ;;  %v1588_v55 = vmax.f32 %v1289_v41, 0.0 }
 0x12a   : > { %v1207_v22 = vpop.f32.mrf.mxu0  ;;  %v1294_v24 = vpop.f32.mrf.mxu1 }
 0x12b   : > { %v1208_v26 = vadd.f32 %v1207_v22, %v4036_v10  ;;  %v1596_v29 = vmax.f32 %v1206_v20, 0.0  ;;  %v1295_v39 = vadd.f32 %v1294_v24, %v4036_v10  ;;  %v1589_v52 = vmax.f32 %v1291_v40, 0.0 }
 0x12c   : > { %v1296_v30 = vpop.f32.mrf.mxu1 }
 0x12d   : > { %v1597_v31 = vmax.f32 %v1208_v26, 0.0  ;;  %v1297_v36 = vadd.f32 %v1296_v30, %v4036_v10  ;;  %v1598_v50 = vmax.f32 %v1295_v39, 0.0 }
 0x12f   : > { %1671 = vmatprep.subr.mxu1 %v1597_v31  ;;  %v1599_v44 = vmax.f32 %v1297_v36, 0.0 }
 0x130   : > { %1672 = vmatpush1.msra.mxu1 %v1596_v29 }
 0x131   : > { %1673 = vmatprep.subr.mxu1 %v1587_v32 }
 0x132   : > { %1674 = vmatpush1.msra.mxu1 %v1586_v33 }
 0x133   : > { %1675 = vmatprep.subr.mxu1 %v1577_v35 }
 0x134   : > { %1676 = vmatpush1.msra.mxu1 %v1576_v37 }
 0x135   : > { %1677 = vmatprep.subr.mxu1 %v1567_v42 }
 0x136   : > { %1678 = vmatpush1.msra.mxu1 %v1566_v48 }
 0x137   : > { %2834 = vmatmul.mubr.msk.f32.vlgmr.msra.gmra.mxu1 %vm1634_vm1, %v4061_v49  ;;  %1760 = vmatprep.subr.mxu1 %v1599_v44 }
 0x138   : > { %1717 = vmatprep.mubr.f32.mxu1 %v3570_v47  ;;  %1761 = vmatpush1.msra.mxu1 %v1598_v50 }
 0x139   : > { %1762 = vmatprep.subr.mxu1 %v1589_v52 }
 0x13a   : > { %1763 = vmatpush1.msra.mxu1 %v1588_v55 }
 0x13b   : > { %2835 = vmatmul.mubr.msk.f32.gmra.mxu1 %vm1634_vm1, %v4071_v58  ;;  %1764 = vmatprep.subr.mxu1 %v1579_v56 }
 0x13c   : > { %1723 = vmatprep.mubr.f32.mxu1 %v3570_v47  ;;  %1765 = vmatpush1.msra.mxu1 %v1578_v57 }
 0x13d   : > { %1766 = vmatprep.subr.mxu1 %v1569_v59 }
 0x13e   : > { %1767 = vmatpush1.msra.mxu1 %v1568_v61 }
 0x13f   : > { %2836 = vmatmul.mubr.msk.f32.gmra.mxu1 %vm1634_vm1, %v4079_v62 }
 0x140   : > { %1729 = vmatprep.mubr.f32.mxu1 %v3570_v47 }
 0x143   : > { %2837 = vmatmul.mubr.msk.f32.gmra.mxu1 %vm1634_vm1, %v4087_v63 }
 0x144   : > { %1800 = vmatprep.mubr.f32.mxu1 %v3570_v47 }
 0x147   : > { %2838 = vmatmul.mubr.msk.f32.vlgmr.msra.gmra.mxu1 %vm1634_vm1, %v4061_v49 }
 0x148   : > { %1806 = vmatprep.mubr.f32.mxu1 %v3570_v47 }
 0x14b   : > { %2839 = vmatmul.mubr.msk.f32.gmra.mxu1 %vm1634_vm1, %v4071_v58 }
 0x14c   : > { %1812 = vmatprep.mubr.f32.mxu1 %v3570_v47 }
 0x14f   : > { %2840 = vmatmul.mubr.msk.f32.gmra.mxu1 %vm1634_vm1, %v4079_v62 }
 0x150   : > { %1818 = vmatprep.mubr.f32.mxu1 %v3570_v47 }
 0x153   : > { %2841 = vmatmul.mubr.msk.f32.gmra.mxu1 %vm1634_vm1, %v4087_v63 }
 0x154   : > { %1889 = vmatprep.mubr.f32.mxu1 %v3570_v47 }
 0x15c   : > { %v1365_v1 = vpop.f32.mrf.mxu0 }
 0x15d   : > { %v1366_v30 = vadd.f32 %v1365_v1, %v4047_v27 }
 0x15e   : > { %v1367_v2 = vpop.f32.mrf.mxu0  ;;  %v1454_v3 = vpop.f32.mrf.mxu1 }
 0x15f   : > { %v1368_v26 = vadd.f32 %v1367_v2, %v4047_v27  ;;  %v1570_v38 = vmax.f32 %v1366_v30, 0.0  ;;  %v1455_v43 = vadd.f32 %v1454_v3, %v4047_v27 }
 0x160   : > { %v1371_v4 = vpop.f32.mrf.mxu0  ;;  %v1456_v5 = vpop.f32.mrf.mxu1 }
 0x161   : > { %v1372_v20 = vadd.f32 %v1371_v4, %v4038_v53  ;;  %v1571_v35 = vmax.f32 %v1368_v26, 0.0  ;;  %v1457_v41 = vadd.f32 %v1456_v5, %v4047_v27  ;;  %v1572_v51 = vmax.f32 %v1455_v43, 0.0  ;;  %v4183_v43 = vld [vmem:[%s4269_s5] sm:$0x1] }
 0x162   : > { %v1373_v6 = vpop.f32.mrf.mxu0  ;;  %v1460_v7 = vpop.f32.mrf.mxu1 }
 0x163   : > { %v1374_v60 = vadd.f32 %v1373_v6, %v4038_v53  ;;  %v1580_v31 = vmax.f32 %v1372_v20, 0.0  ;;  %v1461_v39 = vadd.f32 %v1460_v7, %v4038_v53  ;;  %v1573_v50 = vmax.f32 %v1457_v41, 0.0 }
 0x164   : > { %v1377_v0 = vpop.f32.mrf.mxu0  ;;  %v1462_v8 = vpop.f32.mrf.mxu1 }
 0x165   : > { %v1378_v15 = vadd.f32 %v1377_v0, %v4040_v16  ;;  %v1581_v28 = vmax.f32 %v1374_v60, 0.0  ;;  %v1463_v36 = vadd.f32 %v1462_v8, %v4038_v53  ;;  %v1582_v48 = vmax.f32 %v1461_v39, 0.0  ;;  %v4166_v60 = vpop.permute.xlu1 %1626 }
 0x166   : > { %v1379_v9 = vpop.f32.mrf.mxu0  ;;  %v1466_v46 = vpop.f32.mrf.mxu1 }
 0x167   : > { %v1380_v13 = vadd.f32 %v1379_v9, %v4040_v16  ;;  %v1590_v25 = vmax.f32 %v1378_v15, 0.0  ;;  %v1467_v34 = vadd.f32 %v1466_v46, %v4040_v16  ;;  %v1583_v45 = vmax.f32 %v1463_v36, 0.0 }
 0x168   : > { %v1383_v11 = vpop.f32.mrf.mxu0  ;;  %v1468_v12 = vpop.f32.mrf.mxu1 }
 0x169   : > { %v1384_v14 = vadd.f32 %v1383_v11, %v4036_v10  ;;  %v1591_v23 = vmax.f32 %v1380_v13, 0.0  ;;  %v1469_v33 = vadd.f32 %v1468_v12, %v4040_v16  ;;  %v1592_v44 = vmax.f32 %v1467_v34, 0.0 }
 0x16a   : > { %v1385_v17 = vpop.f32.mrf.mxu0  ;;  %v1472_v18 = vpop.f32.mrf.mxu1 }
 0x16b   : > { %v1386_v19 = vadd.f32 %v1385_v17, %v4036_v10  ;;  %v1600_v21 = vmax.f32 %v1384_v14, 0.0  ;;  %v1473_v32 = vadd.f32 %v1472_v18, %v4036_v10  ;;  %v1593_v42 = vmax.f32 %v1469_v33, 0.0  ;;  %v4164_v18 = vpop.permute.xlu0 %1631 }
 0x16c   : > { %v1474_v22 = vpop.f32.mrf.mxu1 }
 0x16d   : > { %v1601_v24 = vmax.f32 %v1386_v19, 0.0  ;;  %v1475_v29 = vadd.f32 %v1474_v22, %v4036_v10  ;;  %v1602_v40 = vmax.f32 %v1473_v32, 0.0 }
 0x16f   : > { %1849 = vmatprep.subr.mxu1 %v1601_v24  ;;  %v1603_v37 = vmax.f32 %v1475_v29, 0.0  ;;  %v4171_v22 = vpop.permute.xlu0 %1621 }
 0x170   : > { %1850 = vmatpush1.msra.mxu1 %v1600_v21 }
 0x171   : > { %1851 = vmatprep.subr.mxu1 %v1591_v23 }
 0x172   : > { %1852 = vmatpush1.msra.mxu1 %v1590_v25 }
 0x173   : > { %1853 = vmatprep.subr.mxu1 %v1581_v28  ;;  %v4175_v28 = vpop.permute.xlu1 %1616 }
 0x174   : > { %1854 = vmatpush1.msra.mxu1 %v1580_v31 }
 0x175   : > { %1855 = vmatprep.subr.mxu1 %v1571_v35 }
 0x176   : > { %1856 = vmatpush1.msra.mxu1 %v1570_v38 }
 0x177   : > { %2842 = vmatmul.mubr.msk.f32.vlgmr.msra.gmra.mxu1 %vm1634_vm1, %v4061_v49  ;;  %1938 = vmatprep.subr.mxu1 %v1603_v37 }
 0x178   : > { %1939 = vmatpush1.msra.mxu1 %v1602_v40  ;;  %1895 = vmatprep.mubr.f32.mxu1 %v3570_v47 }
 0x179   : > { %1940 = vmatprep.subr.mxu1 %v1593_v42 }
 0x17a   : > { %1941 = vmatpush1.msra.mxu1 %v1592_v44 }
 0x17b   : > { %2843 = vmatmul.mubr.msk.f32.gmra.mxu1 %vm1634_vm1, %v4071_v58  ;;  %1942 = vmatprep.subr.mxu1 %v1583_v45 }
 0x17c   : > { %1901 = vmatprep.mubr.f32.mxu1 %v3570_v47  ;;  %1943 = vmatpush1.msra.mxu1 %v1582_v48 }
 0x17d   : > { %1944 = vmatprep.subr.mxu1 %v1573_v50 }
 0x17e   : > { %1945 = vmatpush1.msra.mxu1 %v1572_v51 }
 0x17f   : > { %2844 = vmatmul.mubr.msk.f32.gmra.mxu1 %vm1634_vm1, %v4079_v62 }
 0x180   : > { %1907 = vmatprep.mubr.f32.mxu1 %v3570_v47 }
 0x183   : > { %2845 = vmatmul.mubr.msk.f32.gmra.mxu1 %vm1634_vm1, %v4087_v63 }
 0x184   : > { %1978 = vmatprep.mubr.f32.mxu1 %v3570_v47 }
 0x187   : > { %2846 = vmatmul.mubr.msk.f32.vlgmr.msra.gmra.mxu1 %vm1634_vm1, %v4061_v49 }
 0x188   : > { %1984 = vmatprep.mubr.f32.mxu1 %v3570_v47 }
 0x18b   : > { %2847 = vmatmul.mubr.msk.f32.gmra.mxu1 %vm1634_vm1, %v4071_v58 }
 0x18c   : > { %1990 = vmatprep.mubr.f32.mxu1 %v3570_v47 }
 0x18f   : > { %2848 = vmatmul.mubr.msk.f32.gmra.mxu1 %vm1634_vm1, %v4079_v62 }
 0x190   : > { %1996 = vmatprep.mubr.f32.mxu1 %v3570_v47 }
 0x193   : > { %2849 = vmatmul.mubr.msk.f32.gmra.mxu1 %vm1634_vm1, %v4087_v63 }
 0x194   : > { %2202 = vmatprep.mubr.f32.mxu1 %v3570_v47 }
 0x19c   : > { %v1543_v52 = vpop.f32.mrf.mxu0 }
 0x19d   : > { %v1544_v11 = vadd.f32 %v1543_v52, %v4047_v27 }
 0x19e   : > { %v1545_v54 = vpop.f32.mrf.mxu0 }
 0x19f   : > { %v1546_v9 = vadd.f32 %v1545_v54, %v4047_v27 }
 0x1a0   : > { %v1549_v55 = vpop.f32.mrf.mxu0 }
 0x1a1   : > { %v1550_v0 = vadd.f32 %v1549_v55, %v4038_v53 }
 0x1a2   : > { %v1551_v56 = vpop.f32.mrf.mxu0 }
 0x1a3   : > { %v1552_v6 = vadd.f32 %v1551_v56, %v4038_v53  ;;  %v1584_v14 = vmax.f32 %v1550_v0, 0.0 }
 0x1a4   : > { %v1555_v57 = vpop.f32.mrf.mxu0 }
 0x1a5   : > { %v1556_v5 = vadd.f32 %v1555_v57, %v4040_v16  ;;  %v1585_v13 = vmax.f32 %v1552_v6, 0.0 }
 0x1a6   : > { %v1557_v59 = vpop.f32.mrf.mxu0 }
 0x1a7   : > { %v1558_v3 = vadd.f32 %v1557_v59, %v4040_v16  ;;  %v1594_v12 = vmax.f32 %v1556_v5, 0.0  ;;  %v1574_v16 = vmax.f32 %v1544_v11, 0.0 }
 0x1a8   : > { %v1561_v61 = vpop.f32.mrf.mxu0 }
 0x1a9   : > { %v1562_v1 = vadd.f32 %v1561_v61, %v4036_v10  ;;  %v1595_v46 = vmax.f32 %v1558_v3, 0.0 }
 0x1aa   : > { %v1563_v2 = vpop.f32.mrf.mxu0 }
 0x1ab   : > { %v1564_v4 = vadd.f32 %v1563_v2, %v4036_v10  ;;  %v1604_v8 = vmax.f32 %v1562_v1, 0.0  ;;  %v1575_v10 = vmax.f32 %v1546_v9, 0.0 }
 0x1ad   : > { %v1605_v7 = vmax.f32 %v1564_v4, 0.0 }
 0x1af   : > { %2027 = vmatprep.subr.mxu0 %v1605_v7 }
 0x1b0   : > { %2028 = vmatpush1.msra.mxu0 %v1604_v8 }
 0x1b1   : > { %2029 = vmatprep.subr.mxu0 %v1595_v46 }
 0x1b2   : > { %2030 = vmatpush1.msra.mxu0 %v1594_v12 }
 0x1b3   : > { %2031 = vmatprep.subr.mxu0 %v1585_v13 }
 0x1b4   : > { %2032 = vmatpush1.msra.mxu0 %v1584_v14 }
 0x1b5   : > { %2033 = vmatprep.subr.mxu0 %v1575_v10 }
 0x1b6   : > { %2034 = vmatpush1.msra.mxu0 %v1574_v16 }
 0x1b7   : > { %2850 = vmatmul.mubr.msk.f32.vlgmr.msra.gmra.mxu0 %vm1634_vm1, %v4061_v49 }
 0x1b8   : > { %2073 = vmatprep.mubr.f32.mxu0 %v3570_v47 }
 0x1bb   : > { %2851 = vmatmul.mubr.msk.f32.gmra.mxu0 %vm1634_vm1, %v4071_v58 }
 0x1bc   : > { %2079 = vmatprep.mubr.f32.mxu0 %v3570_v47 }
 0x1bf   : > { %2852 = vmatmul.mubr.msk.f32.gmra.mxu0 %vm1634_vm1, %v4079_v62 }
 0x1c0   : > { %2085 = vmatprep.mubr.f32.mxu0 %v3570_v47 }
 0x1c3   : > { %2853 = vmatmul.mubr.msk.f32.gmra.mxu0 %vm1634_vm1, %v4087_v63 }
 0x1c4   : > { %2344 = vmatprep.mubr.f32.mxu0 %v3570_v47 }
 0x1f7   : > { %v1713_v53 = vpop.f32.mrf.mxu1 }
 0x1f8   : > { %v1714_v34 = vadd.f32 %v1713_v53, %v4175_v28 }
 0x1f9   : > { %v1715_v27 = vpop.f32.mrf.mxu1 }
 0x1fa   : > { %v1716_v32 = vadd.f32 %v1715_v27, %v4175_v28  ;;  %v2092_v41 = vmax.f32 %v1714_v34, 0.0 }
 0x1fb   : > { %v1719_v49 = vpop.f32.mrf.mxu1 }
 0x1fc   : > { %v1720_v29 = vadd.f32 %v1719_v49, %v4171_v22  ;;  %v2093_v40 = vmax.f32 %v1716_v32, 0.0 }
 0x1fd   : > { %v1721_v15 = vpop.f32.mrf.mxu1 }
 0x1fe   : > { %v1722_v25 = vadd.f32 %v1721_v15, %v4171_v22  ;;  %v2102_v38 = vmax.f32 %v1720_v29, 0.0 }
 0x1ff   : > { %v1725_v17 = vpop.f32.mrf.mxu1 }
 0x200   : > { %v1726_v23 = vadd.f32 %v1725_v17, %v4166_v60  ;;  %v2103_v37 = vmax.f32 %v1722_v25, 0.0 }
 0x201   : > { %v1727_v58 = vpop.f32.mrf.mxu1 }
 0x202   : > { %v1728_v21 = vadd.f32 %v1727_v58, %v4166_v60  ;;  %v2112_v35 = vmax.f32 %v1726_v23, 0.0 }
 0x203   : > { %v1731_v19 = vpop.f32.mrf.mxu1 }
 0x204   : > { %v1732_v62 = vadd.f32 %v1731_v19, %v4164_v18  ;;  %v2113_v33 = vmax.f32 %v1728_v21, 0.0 }
 0x205   : > { %v1733_v20 = vpop.f32.mrf.mxu1 }
 0x206   : > { %v1734_v63 = vadd.f32 %v1733_v20, %v4164_v18  ;;  %v2122_v30 = vmax.f32 %v1732_v62, 0.0 }
 0x207   : > { %v1802_v24 = vpop.f32.mrf.mxu1 }
 0x208   : > { %v2123_v26 = vmax.f32 %v1734_v63, 0.0  ;;  %v1803_v2 = vadd.f32 %v1802_v24, %v4175_v28 }
 0x209   : > { %v1804_v31 = vpop.f32.mrf.mxu1 }
 0x20a   : > { %2162 = vmatprep.subr.mxu1 %v2123_v26  ;;  %v1805_v61 = vadd.f32 %v1804_v31, %v4175_v28  ;;  %v2094_v7 = vmax.f32 %v1803_v2, 0.0 }
 0x20b   : > { %v1808_v36 = vpop.f32.mrf.mxu1  ;;  %2163 = vmatpush1.msra.mxu1 %v2122_v30 }
 0x20c   : > { %2164 = vmatprep.subr.mxu1 %v2113_v33  ;;  %v1809_v57 = vadd.f32 %v1808_v36, %v4171_v22  ;;  %v2095_v6 = vmax.f32 %v1805_v61, 0.0 }
 0x20d   : > { %v1810_v39 = vpop.f32.mrf.mxu1  ;;  %2165 = vmatpush1.msra.mxu1 %v2112_v35 }
 0x20e   : > { %2166 = vmatprep.subr.mxu1 %v2103_v37  ;;  %v1811_v55 = vadd.f32 %v1810_v39, %v4171_v22  ;;  %v2104_v5 = vmax.f32 %v1809_v57, 0.0 }
 0x20f   : > { %v1814_v42 = vpop.f32.mrf.mxu1  ;;  %2167 = vmatpush1.msra.mxu1 %v2102_v38 }
 0x210   : > { %2168 = vmatprep.subr.mxu1 %v2093_v40  ;;  %v1815_v54 = vadd.f32 %v1814_v42, %v4166_v60  ;;  %v2105_v4 = vmax.f32 %v1811_v55, 0.0 }
 0x211   : > { %v1816_v44 = vpop.f32.mrf.mxu1  ;;  %2169 = vmatpush1.msra.mxu1 %v2092_v41 }
 0x212   : > { %2854 = vmatmul.mubr.msk.f32.vlgmr.msra.gmra.mxu1 %vm1634_vm1, %v4183_v43  ;;  %v1817_v51 = vadd.f32 %v1816_v44, %v4166_v60  ;;  %v2114_v3 = vmax.f32 %v1815_v54, 0.0 }
 0x213   : > { %v1820_v45 = vpop.f32.mrf.mxu1  ;;  %2273 = vmatprep.mubr.f32.mxu1 %v3570_v47 }
 0x214   : > { %v1821_v48 = vadd.f32 %v1820_v45, %v4164_v18  ;;  %v2115_v1 = vmax.f32 %v1817_v51, 0.0 }
 0x215   : > { %v1822_v50 = vpop.f32.mrf.mxu1 }
 0x216   : > { %v1823_v52 = vadd.f32 %v1822_v50, %v4164_v18  ;;  %v2124_v59 = vmax.f32 %v1821_v48, 0.0 }
 0x218   : > { %v2125_v56 = vmax.f32 %v1823_v52, 0.0 }
 0x21a   : > { %2233 = vmatprep.subr.mxu1 %v2125_v56 }
 0x21b   : > { %2234 = vmatpush1.msra.mxu1 %v2124_v59 }
 0x21c   : > { %2235 = vmatprep.subr.mxu1 %v2115_v1 }
 0x21d   : > { %2236 = vmatpush1.msra.mxu1 %v2114_v3 }
 0x21e   : > { %2237 = vmatprep.subr.mxu1 %v2105_v4 }
 0x21f   : > { %2238 = vmatpush1.msra.mxu1 %v2104_v5 }
 0x220   : > { %2239 = vmatprep.subr.mxu1 %v2095_v6 }
 0x221   : > { %2240 = vmatpush1.msra.mxu1 %v2094_v7 }
 0x222   : > { %2855 = vmatmul.mubr.msk.f32.vlgmr.msra.gmra.mxu1 %vm1634_vm1, %v4183_v43 }
 0x223   : > { %2415 = vmatprep.mubr.f32.mxu1 %v3570_v47 }
 0x237   : > { %v1891_v0 = vpop.f32.mrf.mxu1 }
 0x238   : > { %v1892_v63 = vadd.f32 %v1891_v0, %v4175_v28 }
 0x239   : > { %v1893_v8 = vpop.f32.mrf.mxu1 }
 0x23a   : > { %v1894_v20 = vadd.f32 %v1893_v8, %v4175_v28  ;;  %v2096_v31 = vmax.f32 %v1892_v63, 0.0 }
 0x23b   : > { %v1897_v9 = vpop.f32.mrf.mxu1 }
 0x23c   : > { %v1898_v58 = vadd.f32 %v1897_v9, %v4171_v22  ;;  %v2097_v30 = vmax.f32 %v1894_v20, 0.0 }
 0x23d   : > { %v1899_v46 = vpop.f32.mrf.mxu1 }
 0x23e   : > { %v1900_v15 = vadd.f32 %v1899_v46, %v4171_v22  ;;  %v2106_v26 = vmax.f32 %v1898_v58, 0.0  ;;  %v2134_v58 = vstv %s2133_s25 }
 0x23f   : > { %v1903_v11 = vpop.f32.mrf.mxu1 }
 0x240   : > { %v1904_v27 = vadd.f32 %v1903_v11, %v4166_v60  ;;  %v2107_v25 = vmax.f32 %v1900_v15, 0.0  ;;  %v2510_v15 = vlaneseq }
 0x241   : > { %v1905_v12 = vpop.f32.mrf.mxu1 }
 0x242   : > { %v1906_v16 = vadd.f32 %v1905_v12, %v4166_v60  ;;  %v2116_v23 = vmax.f32 %v1904_v27, 0.0  ;;  %v2511_v20 = vshrl.u32 %v2510_v15, 7  ;;  %vm2572_vm2 = vcmp.lt.s32.totalorder %v2510_v15, 256 }
 0x243   : > { %v1909_v13 = vpop.f32.mrf.mxu1 }
 0x244   : > { %v1910_v14 = vadd.f32 %v1909_v13, %v4164_v18  ;;  %v2117_v21 = vmax.f32 %v1906_v16, 0.0 }
 0x245   : > { %v1911_v10 = vpop.f32.mrf.mxu1 }
 0x246   : > { %v1912_v53 = vadd.f32 %v1911_v10, %v4164_v18  ;;  %v2126_v19 = vmax.f32 %v1910_v14, 0.0 }
 0x247   : > { %v1980_v49 = vpop.f32.mrf.mxu1 }
 0x248   : > { %v2127_v17 = vmax.f32 %v1912_v53, 0.0 }
 0x249   : > { %v1982_v62 = vpop.f32.mrf.mxu1 }
 0x24a   : > { %2304 = vmatprep.subr.mxu0 %v2127_v17  ;;  %v1983_v45 = vadd.f32 %v1982_v62, %v4175_v28 }
 0x24b   : > { %v1986_v24 = vpop.f32.mrf.mxu1  ;;  %2305 = vmatpush1.msra.mxu0 %v2126_v19 }
 0x24c   : > { %2306 = vmatprep.subr.mxu0 %v2117_v21  ;;  %v1987_v42 = vadd.f32 %v1986_v24, %v4171_v22  ;;  %v2099_v54 = vmax.f32 %v1983_v45, 0.0 }
 0x24d   : > { %v1988_v29 = vpop.f32.mrf.mxu1  ;;  %2307 = vmatpush1.msra.mxu0 %v2116_v23 }
 0x24e   : > { %2308 = vmatprep.subr.mxu0 %v2107_v25  ;;  %v1989_v40 = vadd.f32 %v1988_v29, %v4171_v22  ;;  %v2108_v52 = vmax.f32 %v1987_v42, 0.0 }
 0x24f   : > { %v1992_v32 = vpop.f32.mrf.mxu1  ;;  %2309 = vmatpush1.msra.mxu0 %v2106_v26 }
 0x250   : > { %2310 = vmatprep.subr.mxu0 %v2097_v30  ;;  %v1993_v39 = vadd.f32 %v1992_v32, %v4166_v60  ;;  %v2109_v51 = vmax.f32 %v1989_v40, 0.0 }
 0x251   : > { %v1994_v33 = vpop.f32.mrf.mxu1  ;;  %2311 = vmatpush1.msra.mxu0 %v2096_v31 }
 0x252   : > { %2856 = vmatmul.mubr.msk.f32.vlgmr.msra.gmra.mxu0 %vm1634_vm1, %v4183_v43  ;;  %v1995_v37 = vadd.f32 %v1994_v33, %v4166_v60  ;;  %v2118_v50 = vmax.f32 %v1993_v39, 0.0 }
 0x253   : > { %v1998_v34 = vpop.f32.mrf.mxu1  ;;  %2486 = vmatprep.mubr.f32.mxu0 %v3570_v47  ;;  %v1981_v47 = vadd.f32 %v1980_v49, %v4175_v28  ;;  %v3571_v49 = vmov 1966171168  }
 0x254   : > { %v1999_v35 = vadd.f32 %v1998_v34, %v4164_v18  ;;  %v2119_v48 = vmax.f32 %v1995_v37, 0.0 }
 0x255   : > { %v2000_v36 = vpop.f32.mrf.mxu1  ;;  %v2098_v55 = vmax.f32 %v1981_v47, 0.0 }
 0x256   : > { %v2001_v38 = vadd.f32 %v2000_v36, %v4164_v18  ;;  %v2128_v44 = vmax.f32 %v1999_v35, 0.0 }
 0x258   : > { %v2129_v41 = vmax.f32 %v2001_v38, 0.0 }
 0x25a   : > { %2375 = vmatprep.subr.mxu1 %v2129_v41 }
 0x25b   : > { %2376 = vmatpush1.msra.mxu1 %v2128_v44 }
 0x25c   : > { %2377 = vmatprep.subr.mxu1 %v2119_v48 }
 0x25d   : > { %2378 = vmatpush1.msra.mxu1 %v2118_v50 }
 0x25e   : > { %2379 = vmatprep.subr.mxu1 %v2109_v51 }
 0x25f   : > { %2380 = vmatpush1.msra.mxu1 %v2108_v52 }
 0x260   : > { %2381 = vmatprep.subr.mxu1 %v2099_v54 }
 0x261   : > { %2382 = vmatpush1.msra.mxu1 %v2098_v55 }
 0x262   : > { %2857 = vmatmul.mubr.msk.f32.vlgmr.msra.gmra.mxu1 %vm1634_vm1, %v4183_v43 }
 0x277   : > { %v2069_v56 = vpop.f32.mrf.mxu0 }
 0x278   : > { %v2070_v14 = vadd.f32 %v2069_v56, %v4175_v28 }
 0x279   : > { %v2071_v57 = vpop.f32.mrf.mxu0 }
 0x27a   : > { %v2072_v12 = vadd.f32 %v2071_v57, %v4175_v28  ;;  %v2508_v28 = vunpack.c.l.s4 %v3571_v49 }
 0x27b   : > { %v2075_v59 = vpop.f32.mrf.mxu0 }
 0x27c   : > { %v2076_v46 = vadd.f32 %v2075_v59, %v4171_v22  ;;  %v2509_v62 = vunpack.c.0.s8 %v2508_v28 }
 0x27d   : > { %v2077_v61 = vpop.f32.mrf.mxu0 }
 0x27e   : > { %v2078_v8 = vadd.f32 %v2077_v61, %v4171_v22  ;;  %v2110_v53 = vmax.f32 %v2076_v46, 0.0  ;;  %v2512_v29 = vsub.s32 %v2509_v62, %v2511_v20 }
 0x27f   : > { %v2081_v1 = vpop.f32.mrf.mxu0 }
 0x280   : > { %v2082_v0 = vadd.f32 %v2081_v1, %v4166_v60  ;;  %v2111_v16 = vmax.f32 %v2078_v8, 0.0 }
 0x281   : > { %v2083_v2 = vpop.f32.mrf.mxu0 }
 0x282   : > { %v2084_v6 = vadd.f32 %v2083_v2, %v4166_v60  ;;  %v2120_v10 = vmax.f32 %v2082_v0, 0.0  ;;  %v2100_v60 = vmax.f32 %v2070_v14, 0.0 }
 0x283   : > { %v2087_v3 = vpop.f32.mrf.mxu0 }
 0x284   : > { %v2088_v4 = vadd.f32 %v2087_v3, %v4164_v18  ;;  %v2121_v13 = vmax.f32 %v2084_v6, 0.0 }
 0x285   : > { %v2089_v5 = vpop.f32.mrf.mxu0 }
 0x286   : > { %v2090_v7 = vadd.f32 %v2089_v5, %v4164_v18  ;;  %v2130_v11 = vmax.f32 %v2088_v4, 0.0  ;;  %v2101_v18 = vmax.f32 %v2072_v12, 0.0 }
 0x288   : > { %v2131_v9 = vmax.f32 %v2090_v7, 0.0 }
 0x28a   : > { %2446 = vmatprep.subr.mxu0 %v2131_v9 }
 0x28b   : > { %2447 = vmatpush1.msra.mxu0 %v2130_v11 }
 0x28c   : > { %2448 = vmatprep.subr.mxu0 %v2121_v13 }
 0x28d   : > { %2449 = vmatpush1.msra.mxu0 %v2120_v10 }
 0x28e   : > { %2450 = vmatprep.subr.mxu0 %v2111_v16 }
 0x28f   : > { %2451 = vmatpush1.msra.mxu0 %v2110_v53 }
 0x290   : > { %2452 = vmatprep.subr.mxu0 %v2101_v18 }
 0x291   : > { %2453 = vmatpush1.msra.mxu0 %v2100_v60 }
 0x292   : > { %2858 = vmatmul.mubr.msk.f32.vlgmr.msra.gmra.mxu0 %vm1634_vm1, %v4183_v43 }
 0x2d2   : > { %v2204_v22 = vpop.f32.mrf.mxu1 }
 0x2d3   : > { %v2205_v63 = vadd.f32 %v2204_v22, %v2134_v58 }
 0x2d4   : > { %v2206_v27 = vpop.f32.mrf.mxu1 }
 0x2d5   : > { %v2207_v23 = vadd.f32 %v2206_v27, %v2134_v58 }
 0x2d7   : > { %v2503_v43 = vcombine.low %v2205_v63, %v2207_v23 }
 0x2d9   : > { %v2513_v34 = vrot.slane %v2503_v43, %v2512_v29 }
 0x2e2   : > { %v2275_v17 = vpop.f32.mrf.mxu1 }
 0x2e3   : > { %v2276_v24 = vadd.f32 %v2275_v17, %v2134_v58 }
 0x2e4   : > { %v2277_v21 = vpop.f32.mrf.mxu1 }
 0x2e5   : > { %v2278_v25 = vadd.f32 %v2277_v21, %v2134_v58 }
 0x2e7   : > { %v2504_v30 = vcombine.low %v2276_v24, %v2278_v25 }
 0x2e9   : > { %v2520_v35 = vrot.slane %v2504_v30, %v2512_v29 }
 0x2eb   : > { %v2535_v40 = vcombine.low %v2513_v34, %v2520_v35 }
 0x2ed   : > { %v2543_v45 = vrot.slane %v2535_v40, %v2512_v29 }
 0x312   : > { %v2346_v19 = vpop.f32.mrf.mxu0 }
 0x313   : > { %v2347_v31 = vadd.f32 %v2346_v19, %v2134_v58 }
 0x314   : > { %v2348_v26 = vpop.f32.mrf.mxu0 }
 0x315   : > { %v2349_v32 = vadd.f32 %v2348_v26, %v2134_v58 }
 0x317   : > { %v2505_v37 = vcombine.low %v2347_v31, %v2349_v32 }
 0x319   : > { %v2527_v41 = vrot.slane %v2505_v37, %v2512_v29 }
 0x322   : > { %v2417_v33 = vpop.f32.mrf.mxu1 }
 0x323   : > { %v2418_v36 = vadd.f32 %v2417_v33, %v2134_v58 }
 0x324   : > { %v2419_v38 = vpop.f32.mrf.mxu1 }
 0x325   : > { %v2420_v39 = vadd.f32 %v2419_v38, %v2134_v58 }
 0x327   : > { %v2506_v42 = vcombine.low %v2418_v36, %v2420_v39 }
 0x329   : > { %v2534_v44 = vrot.slane %v2506_v42, %v2512_v29 }
 0x32b   : > { %v2536_v48 = vcombine.low %v2527_v41, %v2534_v44 }
 0x32d   : > { %v2550_v47 = vrot.slane %v2536_v48, %v2512_v29 }
 0x32f   : > { %v2551_v50 = vcombine.low %v2543_v45, %v2550_v47 }
 0x331   : > { %2569 = vst [vmem:[%s273_s9] sm:$0xff] %v2551_v50 }
 0x352   : > { %v2488_v51 = vpop.f32.mrf.mxu0 }
 0x353   : > { %v2489_v54 = vadd.f32 %v2488_v51, %v2134_v58 }
 0x354   : > { %v2490_v52 = vpop.f32.mrf.mxu0 }
 0x355   : > { %v2491_v55 = vadd.f32 %v2490_v52, %v2134_v58 }
 0x357   : > { %v2552_v56 = vcombine.low %v2489_v54, %v2491_v55 }
 0x359   : > { %v2559_v57 = vrot.slane %v2552_v56, %v2512_v29 }
 0x35b   : > { %v2566_v59 = vrot.slane %v2559_v57, %v2512_v29 }
 0x35d   : > { %2574 = vst.msk [vmem:[%s273_s9 + $0x8] sm:$0x3] %vm2572_vm2, %v2566_v59 }
 0x35e   : > { %3520 = shalt.err (!%p3517_p3)
}
 0x35f   : > { %s3521_s23 = scalar_lea.hbm %s2588_s16, 160  ;;  %s3525_s25 = scalar_lea.hbm %s4271_s7, 1280 }
 0x360   : > { %p3522_p4 = scmp.ne.s32.totalorder %s2588_s16, %s3521_s23  ;;  %p3526_p9 = scmp.lt.s32.totalorder %s2588_s16, %s4271_s7 }
 0x361   : > { %p3527_p10 = scmp.lt.s32.totalorder %s3525_s25, %s3521_s23 }
 0x362   : > { %p3523_p7 = pnand %p3522_p4, %p3651_p5 }
 0x363   : > { %p3528_p11 = por %p3527_p10, %p3526_p9 }
 0x364   : > { %p3524_p8 = pneg %p3523_p7 }
 0x366   : > { %p3529_p12 = pnand %p3528_p11, %p3524_p8 }
 0x368   : > { %3532 = shalt.err (!%p3529_p12)
}
 0x369   : > { %3463 = dma.vmem_to_hbm [thread:$0]  (%p3651_p5), %s2591_s10, 160, %s2588_s16, %s2576_s17  }
 0x36a PF: > { %p3469_p13 = scmp.ge.s32.totalorder %s3567_s29, 2  ;;  %s2602_s9 = sand.u32 1, %s3555_s26  }
 0x36b   : > { %s2603_s21 = scalar_lea.sflag [#allocation4], %s2602_s9 }
 0x36c   : > { %p3466_p0 = pnand %p3469_p13, %p3655_p6 }
 0x36e   : > { %p3467_p1 = pneg %p3466_p0 }
 0x370   : > { %3550 = dma.done.wait (%p3467_p1), %s2603_s21, 160  }
 0x371   : > { %3552 = vsyncadd (%p3467_p1), %s2603_s21, 4294967136  ;;  %p18_p2 = scmp.ge.s32.totalorder %s3639_s8, 10   ;;  %s4274_s26 = smov %s3559_s27 }
 0x372   : > { %s4275_s27 = smov %s3563_s28  ;;  %s4276_s28 = smov %s3649_s11 }
 0x373   : > { %s4277_s29 = smov %s3639_s8  ;;  %20 = sbr.rel (!%p18_p2) target bundleno = 5 (0x5), region = 83 }
 0x378   :  { %2608 = vsyncpa [#allocation4], 1 }
 0x379   :  { %2610 = vsyncpa [#allocation4 + $0x1], 1 }

</bundles_post_ra>
